<compile_context>
chip_gen: v5e
topology: v5e:2x2
jax: 0.10.0
libtpu: 0.0.40
codegen_flags: <defaults>
</compile_context>

<pallas_src>
import jax
import jax.numpy as jnp
from jax import lax
from jax.experimental import pallas as pl
from jax.experimental.pallas import tpu as pltpu

_EPS = 1e-5
_P1 = 36   # 6x6 positions after conv1 + maxpool1
_P2 = 22   # conv2 rows kept per sample: covers every valid position ho*6+wo <= 21


# ------------------------------ Pallas kernel ------------------------------- #
def _naive_net_kernel(cols_ref, w1_ref, b1_ref, w2_ref, b2_ref,
                      fc1w_ref, fc1b_ref, fc2w_ref, fc2b_ref, out_ref):
    """One batch tile; every intermediate stays in vregs/VMEM.

    cols_ref : [144*bt, 18] bf16  conv1 im2col; row = ((tap*36)+pos)*bt + n
    w1_ref   : [18, 48]     bf16  conv1 weight, im2col layout
    b1_ref   : [1, 48]      f32
    w2_ref   : [9, 48, 32]  bf16  conv2 weight, tap-major, BN1 folded in
    b2_ref   : [1, 32]      f32   conv2 bias with BN1 shift folded in
    fc1w_ref : [4, 32, 64]  bf16  fc1 per-position blocks, BN2 + flatten folded in
    fc1b_ref : [1, 64]      f32
    fc2w_ref : [64, 2]      f32
    fc2b_ref : [1, 2]       f32
    out_ref  : [bt, 2]      f32
    """
    bt = out_ref.shape[0]
    r1 = _P1 * bt
    r2 = _P2 * bt

    # ---- Conv2d(2,48,3) fused with MaxPool(2,2): one streaming matmul per pool
    # tap, pooled with a running elementwise max; the (tap-invariant) bias is
    # added after the max, then ReLU.  BN1 is folded into conv2 downstream.
    w1 = w1_ref[...]
    m = None
    for t in range(4):
        tap = cols_ref[t * r1:(t + 1) * r1, :]                      # [r1, 18] bf16
        d = jnp.dot(tap, w1, preferred_element_type=jnp.float32)    # [r1, 48] f32
        m = d if m is None else jnp.maximum(m, d)
    z1 = jnp.maximum(m + b1_ref[...], 0.0)        # [r1, 48], row = pos*bt + n

    # ---- Conv2d(48,32,3), tap-outer over the whole tile: tap (kh,kw) needs z1
    # row (pos + kh*6 + kw)*bt + n, i.e. the 8-aligned slice starting at
    # (kh*6+kw)*bt.  Rows with pos%6 > 3 or pos > 21 are garbage and are never
    # read by the pooling stage below.
    acc = None
    for kh in range(3):
        for kw in range(3):
            s = (kh * 6 + kw) * bt
            lhs = z1[s:s + r2, :].astype(jnp.bfloat16)              # aligned slice
            d = jnp.dot(lhs, w2_ref[kh * 3 + kw],
                        preferred_element_type=jnp.float32)
            acc = d if acc is None else acc + d                     # [r2, 32]

    # ---- MaxPool(2,2) + bias + ReLU + fc1, one [bt,32] slab per pooled position.
    # BN2 and the PyTorch NCHW flatten permutation are folded into the per-position
    # fc1 blocks, so no 128-wide feature row is ever assembled.
    b2 = b2_ref[...]
    h = None
    for oh in range(2):
        for ow in range(2):
            zp = None
            for dh in range(2):
                for dw in range(2):
                    pos = (2 * oh + dh) * 6 + (2 * ow + dw)
                    sl = acc[pos * bt:(pos + 1) * bt, :]            # [bt, 32] aligned
                    zp = sl if zp is None else jnp.maximum(zp, sl)
            zp = jnp.maximum(zp + b2, 0.0)                          # pool -> +b2 -> ReLU
            d = jnp.dot(zp.astype(jnp.bfloat16), fc1w_ref[oh * 2 + ow],
                        preferred_element_type=jnp.float32)         # [bt, 64]
            h = d if h is None else h + d
    h = jnp.maximum(h + fc1b_ref[...], 0.0)

    # ---- Linear(64, 2), tiny, kept in f32.
    out_ref[...] = (jnp.dot(h, fc2w_ref[...], preferred_element_type=jnp.float32)
                    + fc2b_ref[...])


# ------------------------------- JAX glue ----------------------------------- #
def _bn_affine(gamma, beta, mean, var):
    scale = gamma / jnp.sqrt(var + _EPS)
    shift = beta - mean * scale
    return scale, shift


def _const_spec(shape):
    zeros = (0,) * len(shape)
    return pl.BlockSpec(shape, lambda i: zeros)     # whole array, VMEM-resident


def _tile_batch(N):
    """Pick (bt, padded_N): bt multiple of 8, >=2 grid steps whenever N >= 16."""
    n8 = ((N + 7) // 8) * 8
    bt = min(32, n8)
    if n8 >= 16:
        bt = max(8, min(32, ((n8 // 2) // 8) * 8))
    n_pad = ((n8 + bt - 1) // bt) * bt
    return bt, n_pad


def _prep_inputs(params, x_nchw, bt, n_total):
    """Parameter folding + conv1 im2col layout (tiny, traced into the same jit)."""
    N = x_nchw.shape[0]
    G = n_total // bt
    x = x_nchw.astype(jnp.float32)
    if n_total != N:
        x = jnp.pad(x, ((0, n_total - N), (0, 0), (0, 0), (0, 0)))
    xh = jnp.transpose(x, (0, 2, 3, 1))                            # NCHW -> NHWC

    # conv1 weights in im2col layout (feature order ci*9 + kh*3 + kw).
    w1k = params["w1"].reshape(48, 18).T.astype(jnp.bfloat16)      # [18, 48]
    b1k = params["b1"].reshape(1, 48).astype(jnp.float32)

    # Fold BN1 inference affine (y -> y*s1 + t1) into conv2.
    s1, t1 = _bn_affine(params["bn1_gamma"], params["bn1_beta"],
                        params["bn1_mean"], params["bn1_var"])     # [48]
    w2_eff = params["w2"] * s1[None, :, None, None]                # [32,48,3,3]
    w2k = jnp.transpose(w2_eff, (2, 3, 1, 0)).reshape(9, 48, 32).astype(jnp.bfloat16)
    b2k = (params["b2"]
           + jnp.einsum("ocij,c->o", params["w2"], t1)).reshape(1, 32).astype(jnp.float32)

    # Fold BN2 + the PyTorch NCHW flatten permutation into fc1, split into the
    # four pooled-position blocks (flatten index = c*4 + oh*2 + ow).
    s2, t2 = _bn_affine(params["bn2_gamma"], params["bn2_beta"],
                        params["bn2_mean"], params["bn2_var"])     # [32]
    fc1 = params["fc1_w"].reshape(64, 32, 4)                       # [out, c, p]
    fc1wk = jnp.transpose(fc1 * s2[None, :, None], (2, 1, 0)).astype(jnp.bfloat16)  # [4,32,64]
    fc1bk = (params["fc1_b"]
             + (fc1 * t2[None, :, None]).sum(axis=(1, 2))).reshape(1, 64).astype(jnp.float32)

    fc2wk = params["fc2_w"].T.astype(jnp.float32)                  # [64, 2]
    fc2bk = params["fc2_b"].reshape(1, 2).astype(jnp.float32)

    # conv1 im2col, pool-tap-major / position-major / sample-minor per grid tile:
    #   cols[g, ((dh*2+dw)*36 + i*6 + j)*bt + n, ci*9+kh*3+kw]
    #     = x[g*bt + n, ci, 2i+dh+kh, 2j+dw+kw]
    cols = jnp.stack([xh[:, kh:kh + 12, kw:kw + 12, :]
                      for kh in range(3) for kw in range(3)], axis=-1)  # [Np,12,12,2,9]
    cols = cols.reshape(n_total, 12, 12, 18)
    cols = cols.reshape(G, bt, 6, 2, 6, 2, 18)                      # (g,n,i,dh,j,dw,f)
    cols = jnp.transpose(cols, (0, 3, 5, 2, 4, 1, 6))               # (g,dh,dw,i,j,n,f)
    cols = cols.reshape(G, 144 * bt, 18).astype(jnp.bfloat16)
    return cols, w1k, b1k, w2k, b2k, fc1wk, fc1bk, fc2wk, fc2bk


def naive_net_forward(params, x_nchw):
    N = x_nchw.shape[0]
    bt, n_total = _tile_batch(N)
    G = n_total // bt
    inputs = _prep_inputs(params, x_nchw, bt, n_total)

    cols_spec = pl.BlockSpec((None, 144 * bt, 18), lambda i: (i, 0, 0))
    in_specs = [cols_spec] + [_const_spec(a.shape) for a in inputs[1:]]

    out = pl.pallas_call(
        _naive_net_kernel,
        out_shape=jax.ShapeDtypeStruct((n_total, 2), jnp.float32),
        grid=(G,),
        in_specs=in_specs,
        out_specs=pl.BlockSpec((bt, 2), lambda i: (i, 0)),
        compiler_params=pltpu.CompilerParams(
            dimension_semantics=("parallel",)),
    )(*inputs)
    return out[:N] if n_total != N else out


# --------------------------- pure-JAX reference ------------------------------ #
def _reference_forward(params, x):
    def bn(y, g, b, m, v):
        s = g / jnp.sqrt(v + _EPS)
        return y * s[None, :, None, None] + (b - m * s)[None, :, None, None]

    def conv(y, w, b):
        out = lax.conv_general_dilated(y, w, (1, 1), "VALID",
                                       dimension_numbers=("NCHW", "OIHW", "NCHW"))
        return out + b[None, :, None, None]

    def pool(y):
        n, c, hh, ww = y.shape
        return y.reshape(n, c, hh // 2, 2, ww // 2, 2).max(axis=(3, 5))

    y = conv(x.astype(jnp.float32), params["w1"], params["b1"])
    y = jnp.maximum(pool(y), 0.0)
    y = bn(y, params["bn1_gamma"], params["bn1_beta"], params["bn1_mean"], params["bn1_var"])
    y = conv(y, params["w2"], params["b2"])
    y = jnp.maximum(pool(y), 0.0)
    y = bn(y, params["bn2_gamma"], params["bn2_beta"], params["bn2_mean"], params["bn2_var"])
    y = y.reshape(y.shape[0], -1)
    y = jnp.maximum(y @ params["fc1_w"].T + params["fc1_b"], 0.0)
    return y @ params["fc2_w"].T + params["fc2_b"]


# ---------------------------- parameter setup ------------------------------- #
def init_params(key):
    ks = jax.random.split(key, 16)

    def uniform_fan(k, shape, fan_in):
        bound = 1.0 / jnp.sqrt(float(fan_in))
        return jax.random.uniform(k, shape, jnp.float32, -bound, bound)

    return {
        "w1": uniform_fan(ks[0], (48, 2, 3, 3), 2 * 9),
        "b1": uniform_fan(ks[1], (48,), 2 * 9),
        "w2": uniform_fan(ks[2], (32, 48, 3, 3), 48 * 9),
        "b2": uniform_fan(ks[3], (32,), 48 * 9),
        "fc1_w": uniform_fan(ks[4], (64, 128), 128),
        "fc1_b": uniform_fan(ks[5], (64,), 128),
        "fc2_w": uniform_fan(ks[6], (2, 64), 64),
        "fc2_b": uniform_fan(ks[7], (2,), 64),
        # BatchNorm2d(48) — inference-mode running stats + affine
        "bn1_gamma": 1.0 + 0.1 * jax.random.normal(ks[8], (48,), jnp.float32),
        "bn1_beta": 0.1 * jax.random.normal(ks[9], (48,), jnp.float32),
        "bn1_mean": 0.05 * jax.random.normal(ks[10], (48,), jnp.float32),
        "bn1_var": jax.random.uniform(ks[11], (48,), jnp.float32, 0.5, 1.5),
        # BatchNorm2d(32)
        "bn2_gamma": 1.0 + 0.1 * jax.random.normal(ks[12], (32,), jnp.float32),
        "bn2_beta": 0.1 * jax.random.normal(ks[13], (32,), jnp.float32),
        "bn2_mean": 0.05 * jax.random.normal(ks[14], (32,), jnp.float32),
        "bn2_var": jax.random.uniform(ks[15], (32,), jnp.float32, 0.5, 1.5),
    }


if __name__ == "__main__":
    key = jax.random.PRNGKey(0)
    x_key, p_key = jax.random.split(key)

    # Module's forward implies fixed 2x14x14 inputs (flatten -> 128); batch = 2.
    x = jax.random.normal(x_key, (2, 2, 14, 14), jnp.float32)  # NCHW, like PyTorch
    params = init_params(p_key)

    out = jax.jit(naive_net_forward)(params, x)
    out = jax.block_until_ready(out)
    assert out.shape == (2, 2) and out.dtype == jnp.float32
    assert bool(jnp.all(jnp.isfinite(out)))

    ref = _reference_forward(params, x)
    # bf16 MXU operands with f32 accumulation -> small numeric drift vs f32 ref.
    assert bool(jnp.allclose(out, ref, atol=8e-2, rtol=8e-2)), (out, ref)
    print("KERNEL_OK")
</pallas_src>

<mosaic_0001>
module attributes {stable_mosaic.version = 11 : i64} {
  func.func @_naive_net_kernel(%arg0: i32, %arg1: memref<1x1152x18xbf16, #tpu.memory_space<vmem>>, %arg2: memref<18x48xbf16, #tpu.memory_space<vmem>>, %arg3: memref<1x48xf32, #tpu.memory_space<vmem>>, %arg4: memref<9x48x32xbf16, #tpu.memory_space<vmem>>, %arg5: memref<1x32xf32, #tpu.memory_space<vmem>>, %arg6: memref<4x32x64xbf16, #tpu.memory_space<vmem>>, %arg7: memref<1x64xf32, #tpu.memory_space<vmem>>, %arg8: memref<64x2xf32, #tpu.memory_space<vmem>>, %arg9: memref<1x2xf32, #tpu.memory_space<vmem>>, %arg10: memref<8x2xf32, #tpu.memory_space<vmem>>) attributes {dimension_semantics = [#tpu.dimension_semantics<parallel>], iteration_bounds = array<i64: 1>, scalar_prefetch = 0 : i64, scratch_operands = 0 : i64, tpu.core_type = #tpu.core_type<tc>, window_params = [{transform_indices = @transform_0, window_bounds = array<i64: 1, 1152, 18>}, {pipeline_mode = #tpu.pipeline_mode<synchronous>, transform_indices = @transform_1, window_bounds = array<i64: 18, 48>}, {pipeline_mode = #tpu.pipeline_mode<synchronous>, transform_indices = @transform_2, window_bounds = array<i64: 1, 48>}, {pipeline_mode = #tpu.pipeline_mode<synchronous>, transform_indices = @transform_3, window_bounds = array<i64: 9, 48, 32>}, {pipeline_mode = #tpu.pipeline_mode<synchronous>, transform_indices = @transform_4, window_bounds = array<i64: 1, 32>}, {pipeline_mode = #tpu.pipeline_mode<synchronous>, transform_indices = @transform_5, window_bounds = array<i64: 4, 32, 64>}, {pipeline_mode = #tpu.pipeline_mode<synchronous>, transform_indices = @transform_6, window_bounds = array<i64: 1, 64>}, {pipeline_mode = #tpu.pipeline_mode<synchronous>, transform_indices = @transform_7, window_bounds = array<i64: 64, 2>}, {pipeline_mode = #tpu.pipeline_mode<synchronous>, transform_indices = @transform_8, window_bounds = array<i64: 1, 2>}, {transform_indices = @transform_9, window_bounds = array<i64: 8, 2>}]} {
    %c0 = arith.constant 0 : index
    %c0_0 = arith.constant 0 : index
    %0 = vector.load %arg2[%c0, %c0_0] : memref<18x48xbf16, #tpu.memory_space<vmem>>, vector<18x48xbf16>
    %c0_1 = arith.constant 0 : index
    %c0_2 = arith.constant 0 : index
    %c0_3 = arith.constant 0 : index
    %1 = vector.load %arg1[%c0_1, %c0_2, %c0_3] : memref<1x1152x18xbf16, #tpu.memory_space<vmem>>, vector<1x288x18xbf16>
    %2 = vector.shape_cast %1 : vector<1x288x18xbf16> to vector<288x18xbf16>
    %cst = arith.constant dense<0.000000e+00> : vector<288x48xf32>
    %3 = tpu.matmul %2, %0, %cst {dimension_numbers = #tpu.dot_dimension_numbers<[1], [0], [0], [1], [0, 0, 1, 1], [], []>} : vector<288x18xbf16>, vector<18x48xbf16>, vector<288x48xf32> -> vector<288x48xf32>
    %c0_4 = arith.constant 0 : index
    %c288 = arith.constant 288 : index
    %c0_5 = arith.constant 0 : index
    %4 = vector.load %arg1[%c0_4, %c288, %c0_5] : memref<1x1152x18xbf16, #tpu.memory_space<vmem>>, vector<1x288x18xbf16>
    %5 = vector.shape_cast %4 : vector<1x288x18xbf16> to vector<288x18xbf16>
    %cst_6 = arith.constant dense<0.000000e+00> : vector<288x48xf32>
    %6 = tpu.matmul %5, %0, %cst_6 {dimension_numbers = #tpu.dot_dimension_numbers<[1], [0], [0], [1], [0, 0, 1, 1], [], []>} : vector<288x18xbf16>, vector<18x48xbf16>, vector<288x48xf32> -> vector<288x48xf32>
    %7 = arith.maximumf %3, %6 : vector<288x48xf32>
    %c0_7 = arith.constant 0 : index
    %c576 = arith.constant 576 : index
    %c0_8 = arith.constant 0 : index
    %8 = vector.load %arg1[%c0_7, %c576, %c0_8] : memref<1x1152x18xbf16, #tpu.memory_space<vmem>>, vector<1x288x18xbf16>
    %9 = vector.shape_cast %8 : vector<1x288x18xbf16> to vector<288x18xbf16>
    %cst_9 = arith.constant dense<0.000000e+00> : vector<288x48xf32>
    %10 = tpu.matmul %9, %0, %cst_9 {dimension_numbers = #tpu.dot_dimension_numbers<[1], [0], [0], [1], [0, 0, 1, 1], [], []>} : vector<288x18xbf16>, vector<18x48xbf16>, vector<288x48xf32> -> vector<288x48xf32>
    %11 = arith.maximumf %7, %10 : vector<288x48xf32>
    %c0_10 = arith.constant 0 : index
    %c864 = arith.constant 864 : index
    %c0_11 = arith.constant 0 : index
    %12 = vector.load %arg1[%c0_10, %c864, %c0_11] : memref<1x1152x18xbf16, #tpu.memory_space<vmem>>, vector<1x288x18xbf16>
    %13 = vector.shape_cast %12 : vector<1x288x18xbf16> to vector<288x18xbf16>
    %cst_12 = arith.constant dense<0.000000e+00> : vector<288x48xf32>
    %14 = tpu.matmul %13, %0, %cst_12 {dimension_numbers = #tpu.dot_dimension_numbers<[1], [0], [0], [1], [0, 0, 1, 1], [], []>} : vector<288x18xbf16>, vector<18x48xbf16>, vector<288x48xf32> -> vector<288x48xf32>
    %15 = arith.maximumf %11, %14 : vector<288x48xf32>
    %c0_13 = arith.constant 0 : index
    %c0_14 = arith.constant 0 : index
    %16 = vector.load %arg3[%c0_13, %c0_14] : memref<1x48xf32, #tpu.memory_space<vmem>>, vector<1x48xf32>
    %17 = vector.broadcast %16 : vector<1x48xf32> to vector<288x48xf32>
    %18 = arith.addf %15, %17 : vector<288x48xf32>
    %cst_15 = arith.constant 0.000000e+00 : f32
    %19 = vector.broadcast %cst_15 : f32 to vector<288x48xf32>
    %20 = arith.maximumf %18, %19 : vector<288x48xf32>
    %21 = vector.extract_strided_slice %20 {offsets = [0, 0], sizes = [176, 48], strides = [1, 1]} : vector<288x48xf32> to vector<176x48xf32>
    %22 = arith.truncf %21 : vector<176x48xf32> to vector<176x48xbf16>
    %c0_16 = arith.constant 0 : index
    %c0_17 = arith.constant 0 : index
    %c0_18 = arith.constant 0 : index
    %23 = vector.load %arg4[%c0_16, %c0_17, %c0_18] : memref<9x48x32xbf16, #tpu.memory_space<vmem>>, vector<1x48x32xbf16>
    %24 = vector.shape_cast %23 : vector<1x48x32xbf16> to vector<48x32xbf16>
    %cst_19 = arith.constant dense<0.000000e+00> : vector<176x32xf32>
    %25 = tpu.matmul %22, %24, %cst_19 {dimension_numbers = #tpu.dot_dimension_numbers<[1], [0], [0], [1], [0, 0, 1, 1], [], []>} : vector<176x48xbf16>, vector<48x32xbf16>, vector<176x32xf32> -> vector<176x32xf32>
    %26 = vector.extract_strided_slice %20 {offsets = [8, 0], sizes = [176, 48], strides = [1, 1]} : vector<288x48xf32> to vector<176x48xf32>
    %27 = arith.truncf %26 : vector<176x48xf32> to vector<176x48xbf16>
    %c1 = arith.constant 1 : index
    %c0_20 = arith.constant 0 : index
    %c0_21 = arith.constant 0 : index
    %28 = vector.load %arg4[%c1, %c0_20, %c0_21] : memref<9x48x32xbf16, #tpu.memory_space<vmem>>, vector<1x48x32xbf16>
    %29 = vector.shape_cast %28 : vector<1x48x32xbf16> to vector<48x32xbf16>
    %cst_22 = arith.constant dense<0.000000e+00> : vector<176x32xf32>
    %30 = tpu.matmul %27, %29, %cst_22 {dimension_numbers = #tpu.dot_dimension_numbers<[1], [0], [0], [1], [0, 0, 1, 1], [], []>} : vector<176x48xbf16>, vector<48x32xbf16>, vector<176x32xf32> -> vector<176x32xf32>
    %31 = arith.addf %25, %30 : vector<176x32xf32>
    %32 = vector.extract_strided_slice %20 {offsets = [16, 0], sizes = [176, 48], strides = [1, 1]} : vector<288x48xf32> to vector<176x48xf32>
    %33 = arith.truncf %32 : vector<176x48xf32> to vector<176x48xbf16>
    %c2 = arith.constant 2 : index
    %c0_23 = arith.constant 0 : index
    %c0_24 = arith.constant 0 : index
    %34 = vector.load %arg4[%c2, %c0_23, %c0_24] : memref<9x48x32xbf16, #tpu.memory_space<vmem>>, vector<1x48x32xbf16>
    %35 = vector.shape_cast %34 : vector<1x48x32xbf16> to vector<48x32xbf16>
    %cst_25 = arith.constant dense<0.000000e+00> : vector<176x32xf32>
    %36 = tpu.matmul %33, %35, %cst_25 {dimension_numbers = #tpu.dot_dimension_numbers<[1], [0], [0], [1], [0, 0, 1, 1], [], []>} : vector<176x48xbf16>, vector<48x32xbf16>, vector<176x32xf32> -> vector<176x32xf32>
    %37 = arith.addf %31, %36 : vector<176x32xf32>
    %38 = vector.extract_strided_slice %20 {offsets = [48, 0], sizes = [176, 48], strides = [1, 1]} : vector<288x48xf32> to vector<176x48xf32>
    %39 = arith.truncf %38 : vector<176x48xf32> to vector<176x48xbf16>
    %c3 = arith.constant 3 : index
    %c0_26 = arith.constant 0 : index
    %c0_27 = arith.constant 0 : index
    %40 = vector.load %arg4[%c3, %c0_26, %c0_27] : memref<9x48x32xbf16, #tpu.memory_space<vmem>>, vector<1x48x32xbf16>
    %41 = vector.shape_cast %40 : vector<1x48x32xbf16> to vector<48x32xbf16>
    %cst_28 = arith.constant dense<0.000000e+00> : vector<176x32xf32>
    %42 = tpu.matmul %39, %41, %cst_28 {dimension_numbers = #tpu.dot_dimension_numbers<[1], [0], [0], [1], [0, 0, 1, 1], [], []>} : vector<176x48xbf16>, vector<48x32xbf16>, vector<176x32xf32> -> vector<176x32xf32>
    %43 = arith.addf %37, %42 : vector<176x32xf32>
    %44 = vector.extract_strided_slice %20 {offsets = [56, 0], sizes = [176, 48], strides = [1, 1]} : vector<288x48xf32> to vector<176x48xf32>
    %45 = arith.truncf %44 : vector<176x48xf32> to vector<176x48xbf16>
    %c4 = arith.constant 4 : index
    %c0_29 = arith.constant 0 : index
    %c0_30 = arith.constant 0 : index
    %46 = vector.load %arg4[%c4, %c0_29, %c0_30] : memref<9x48x32xbf16, #tpu.memory_space<vmem>>, vector<1x48x32xbf16>
    %47 = vector.shape_cast %46 : vector<1x48x32xbf16> to vector<48x32xbf16>
    %cst_31 = arith.constant dense<0.000000e+00> : vector<176x32xf32>
    %48 = tpu.matmul %45, %47, %cst_31 {dimension_numbers = #tpu.dot_dimension_numbers<[1], [0], [0], [1], [0, 0, 1, 1], [], []>} : vector<176x48xbf16>, vector<48x32xbf16>, vector<176x32xf32> -> vector<176x32xf32>
    %49 = arith.addf %43, %48 : vector<176x32xf32>
    %50 = vector.extract_strided_slice %20 {offsets = [64, 0], sizes = [176, 48], strides = [1, 1]} : vector<288x48xf32> to vector<176x48xf32>
    %51 = arith.truncf %50 : vector<176x48xf32> to vector<176x48xbf16>
    %c5 = arith.constant 5 : index
    %c0_32 = arith.constant 0 : index
    %c0_33 = arith.constant 0 : index
    %52 = vector.load %arg4[%c5, %c0_32, %c0_33] : memref<9x48x32xbf16, #tpu.memory_space<vmem>>, vector<1x48x32xbf16>
    %53 = vector.shape_cast %52 : vector<1x48x32xbf16> to vector<48x32xbf16>
    %cst_34 = arith.constant dense<0.000000e+00> : vector<176x32xf32>
    %54 = tpu.matmul %51, %53, %cst_34 {dimension_numbers = #tpu.dot_dimension_numbers<[1], [0], [0], [1], [0, 0, 1, 1], [], []>} : vector<176x48xbf16>, vector<48x32xbf16>, vector<176x32xf32> -> vector<176x32xf32>
    %55 = arith.addf %49, %54 : vector<176x32xf32>
    %56 = vector.extract_strided_slice %20 {offsets = [96, 0], sizes = [176, 48], strides = [1, 1]} : vector<288x48xf32> to vector<176x48xf32>
    %57 = arith.truncf %56 : vector<176x48xf32> to vector<176x48xbf16>
    %c6 = arith.constant 6 : index
    %c0_35 = arith.constant 0 : index
    %c0_36 = arith.constant 0 : index
    %58 = vector.load %arg4[%c6, %c0_35, %c0_36] : memref<9x48x32xbf16, #tpu.memory_space<vmem>>, vector<1x48x32xbf16>
    %59 = vector.shape_cast %58 : vector<1x48x32xbf16> to vector<48x32xbf16>
    %cst_37 = arith.constant dense<0.000000e+00> : vector<176x32xf32>
    %60 = tpu.matmul %57, %59, %cst_37 {dimension_numbers = #tpu.dot_dimension_numbers<[1], [0], [0], [1], [0, 0, 1, 1], [], []>} : vector<176x48xbf16>, vector<48x32xbf16>, vector<176x32xf32> -> vector<176x32xf32>
    %61 = arith.addf %55, %60 : vector<176x32xf32>
    %62 = vector.extract_strided_slice %20 {offsets = [104, 0], sizes = [176, 48], strides = [1, 1]} : vector<288x48xf32> to vector<176x48xf32>
    %63 = arith.truncf %62 : vector<176x48xf32> to vector<176x48xbf16>
    %c7 = arith.constant 7 : index
    %c0_38 = arith.constant 0 : index
    %c0_39 = arith.constant 0 : index
    %64 = vector.load %arg4[%c7, %c0_38, %c0_39] : memref<9x48x32xbf16, #tpu.memory_space<vmem>>, vector<1x48x32xbf16>
    %65 = vector.shape_cast %64 : vector<1x48x32xbf16> to vector<48x32xbf16>
    %cst_40 = arith.constant dense<0.000000e+00> : vector<176x32xf32>
    %66 = tpu.matmul %63, %65, %cst_40 {dimension_numbers = #tpu.dot_dimension_numbers<[1], [0], [0], [1], [0, 0, 1, 1], [], []>} : vector<176x48xbf16>, vector<48x32xbf16>, vector<176x32xf32> -> vector<176x32xf32>
    %67 = arith.addf %61, %66 : vector<176x32xf32>
    %68 = vector.extract_strided_slice %20 {offsets = [112, 0], sizes = [176, 48], strides = [1, 1]} : vector<288x48xf32> to vector<176x48xf32>
    %69 = arith.truncf %68 : vector<176x48xf32> to vector<176x48xbf16>
    %c8 = arith.constant 8 : index
    %c0_41 = arith.constant 0 : index
    %c0_42 = arith.constant 0 : index
    %70 = vector.load %arg4[%c8, %c0_41, %c0_42] : memref<9x48x32xbf16, #tpu.memory_space<vmem>>, vector<1x48x32xbf16>
    %71 = vector.shape_cast %70 : vector<1x48x32xbf16> to vector<48x32xbf16>
    %cst_43 = arith.constant dense<0.000000e+00> : vector<176x32xf32>
    %72 = tpu.matmul %69, %71, %cst_43 {dimension_numbers = #tpu.dot_dimension_numbers<[1], [0], [0], [1], [0, 0, 1, 1], [], []>} : vector<176x48xbf16>, vector<48x32xbf16>, vector<176x32xf32> -> vector<176x32xf32>
    %73 = arith.addf %67, %72 : vector<176x32xf32>
    %c0_44 = arith.constant 0 : index
    %c0_45 = arith.constant 0 : index
    %74 = vector.load %arg5[%c0_44, %c0_45] : memref<1x32xf32, #tpu.memory_space<vmem>>, vector<1x32xf32>
    %75 = vector.extract_strided_slice %73 {offsets = [0, 0], sizes = [8, 32], strides = [1, 1]} : vector<176x32xf32> to vector<8x32xf32>
    %76 = vector.extract_strided_slice %73 {offsets = [8, 0], sizes = [8, 32], strides = [1, 1]} : vector<176x32xf32> to vector<8x32xf32>
    %77 = arith.maximumf %75, %76 : vector<8x32xf32>
    %78 = vector.extract_strided_slice %73 {offsets = [48, 0], sizes = [8, 32], strides = [1, 1]} : vector<176x32xf32> to vector<8x32xf32>
    %79 = arith.maximumf %77, %78 : vector<8x32xf32>
    %80 = vector.extract_strided_slice %73 {offsets = [56, 0], sizes = [8, 32], strides = [1, 1]} : vector<176x32xf32> to vector<8x32xf32>
    %81 = arith.maximumf %79, %80 : vector<8x32xf32>
    %82 = vector.broadcast %74 : vector<1x32xf32> to vector<8x32xf32>
    %83 = arith.addf %81, %82 : vector<8x32xf32>
    %cst_46 = arith.constant 0.000000e+00 : f32
    %84 = vector.broadcast %cst_46 : f32 to vector<8x32xf32>
    %85 = arith.maximumf %83, %84 : vector<8x32xf32>
    %86 = arith.truncf %85 : vector<8x32xf32> to vector<8x32xbf16>
    %c0_47 = arith.constant 0 : index
    %c0_48 = arith.constant 0 : index
    %c0_49 = arith.constant 0 : index
    %87 = vector.load %arg6[%c0_47, %c0_48, %c0_49] : memref<4x32x64xbf16, #tpu.memory_space<vmem>>, vector<1x32x64xbf16>
    %88 = vector.shape_cast %87 : vector<1x32x64xbf16> to vector<32x64xbf16>
    %cst_50 = arith.constant dense<0.000000e+00> : vector<8x64xf32>
    %89 = tpu.matmul %86, %88, %cst_50 {dimension_numbers = #tpu.dot_dimension_numbers<[1], [0], [0], [1], [0, 0, 1, 1], [], []>} : vector<8x32xbf16>, vector<32x64xbf16>, vector<8x64xf32> -> vector<8x64xf32>
    %90 = vector.extract_strided_slice %73 {offsets = [16, 0], sizes = [8, 32], strides = [1, 1]} : vector<176x32xf32> to vector<8x32xf32>
    %91 = vector.extract_strided_slice %73 {offsets = [24, 0], sizes = [8, 32], strides = [1, 1]} : vector<176x32xf32> to vector<8x32xf32>
    %92 = arith.maximumf %90, %91 : vector<8x32xf32>
    %93 = vector.extract_strided_slice %73 {offsets = [64, 0], sizes = [8, 32], strides = [1, 1]} : vector<176x32xf32> to vector<8x32xf32>
    %94 = arith.maximumf %92, %93 : vector<8x32xf32>
    %95 = vector.extract_strided_slice %73 {offsets = [72, 0], sizes = [8, 32], strides = [1, 1]} : vector<176x32xf32> to vector<8x32xf32>
    %96 = arith.maximumf %94, %95 : vector<8x32xf32>
    %97 = vector.broadcast %74 : vector<1x32xf32> to vector<8x32xf32>
    %98 = arith.addf %96, %97 : vector<8x32xf32>
    %cst_51 = arith.constant 0.000000e+00 : f32
    %99 = vector.broadcast %cst_51 : f32 to vector<8x32xf32>
    %100 = arith.maximumf %98, %99 : vector<8x32xf32>
    %101 = arith.truncf %100 : vector<8x32xf32> to vector<8x32xbf16>
    %c1_52 = arith.constant 1 : index
    %c0_53 = arith.constant 0 : index
    %c0_54 = arith.constant 0 : index
    %102 = vector.load %arg6[%c1_52, %c0_53, %c0_54] : memref<4x32x64xbf16, #tpu.memory_space<vmem>>, vector<1x32x64xbf16>
    %103 = vector.shape_cast %102 : vector<1x32x64xbf16> to vector<32x64xbf16>
    %cst_55 = arith.constant dense<0.000000e+00> : vector<8x64xf32>
    %104 = tpu.matmul %101, %103, %cst_55 {dimension_numbers = #tpu.dot_dimension_numbers<[1], [0], [0], [1], [0, 0, 1, 1], [], []>} : vector<8x32xbf16>, vector<32x64xbf16>, vector<8x64xf32> -> vector<8x64xf32>
    %105 = arith.addf %89, %104 : vector<8x64xf32>
    %106 = vector.extract_strided_slice %73 {offsets = [96, 0], sizes = [8, 32], strides = [1, 1]} : vector<176x32xf32> to vector<8x32xf32>
    %107 = vector.extract_strided_slice %73 {offsets = [104, 0], sizes = [8, 32], strides = [1, 1]} : vector<176x32xf32> to vector<8x32xf32>
    %108 = arith.maximumf %106, %107 : vector<8x32xf32>
    %109 = vector.extract_strided_slice %73 {offsets = [144, 0], sizes = [8, 32], strides = [1, 1]} : vector<176x32xf32> to vector<8x32xf32>
    %110 = arith.maximumf %108, %109 : vector<8x32xf32>
    %111 = vector.extract_strided_slice %73 {offsets = [152, 0], sizes = [8, 32], strides = [1, 1]} : vector<176x32xf32> to vector<8x32xf32>
    %112 = arith.maximumf %110, %111 : vector<8x32xf32>
    %113 = vector.broadcast %74 : vector<1x32xf32> to vector<8x32xf32>
    %114 = arith.addf %112, %113 : vector<8x32xf32>
    %cst_56 = arith.constant 0.000000e+00 : f32
    %115 = vector.broadcast %cst_56 : f32 to vector<8x32xf32>
    %116 = arith.maximumf %114, %115 : vector<8x32xf32>
    %117 = arith.truncf %116 : vector<8x32xf32> to vector<8x32xbf16>
    %c2_57 = arith.constant 2 : index
    %c0_58 = arith.constant 0 : index
    %c0_59 = arith.constant 0 : index
    %118 = vector.load %arg6[%c2_57, %c0_58, %c0_59] : memref<4x32x64xbf16, #tpu.memory_space<vmem>>, vector<1x32x64xbf16>
    %119 = vector.shape_cast %118 : vector<1x32x64xbf16> to vector<32x64xbf16>
    %cst_60 = arith.constant dense<0.000000e+00> : vector<8x64xf32>
    %120 = tpu.matmul %117, %119, %cst_60 {dimension_numbers = #tpu.dot_dimension_numbers<[1], [0], [0], [1], [0, 0, 1, 1], [], []>} : vector<8x32xbf16>, vector<32x64xbf16>, vector<8x64xf32> -> vector<8x64xf32>
    %121 = arith.addf %105, %120 : vector<8x64xf32>
    %122 = vector.extract_strided_slice %73 {offsets = [112, 0], sizes = [8, 32], strides = [1, 1]} : vector<176x32xf32> to vector<8x32xf32>
    %123 = vector.extract_strided_slice %73 {offsets = [120, 0], sizes = [8, 32], strides = [1, 1]} : vector<176x32xf32> to vector<8x32xf32>
    %124 = arith.maximumf %122, %123 : vector<8x32xf32>
    %125 = vector.extract_strided_slice %73 {offsets = [160, 0], sizes = [8, 32], strides = [1, 1]} : vector<176x32xf32> to vector<8x32xf32>
    %126 = arith.maximumf %124, %125 : vector<8x32xf32>
    %127 = vector.extract_strided_slice %73 {offsets = [168, 0], sizes = [8, 32], strides = [1, 1]} : vector<176x32xf32> to vector<8x32xf32>
    %128 = arith.maximumf %126, %127 : vector<8x32xf32>
    %129 = vector.broadcast %74 : vector<1x32xf32> to vector<8x32xf32>
    %130 = arith.addf %128, %129 : vector<8x32xf32>
    %cst_61 = arith.constant 0.000000e+00 : f32
    %131 = vector.broadcast %cst_61 : f32 to vector<8x32xf32>
    %132 = arith.maximumf %130, %131 : vector<8x32xf32>
    %133 = arith.truncf %132 : vector<8x32xf32> to vector<8x32xbf16>
    %c3_62 = arith.constant 3 : index
    %c0_63 = arith.constant 0 : index
    %c0_64 = arith.constant 0 : index
    %134 = vector.load %arg6[%c3_62, %c0_63, %c0_64] : memref<4x32x64xbf16, #tpu.memory_space<vmem>>, vector<1x32x64xbf16>
    %135 = vector.shape_cast %134 : vector<1x32x64xbf16> to vector<32x64xbf16>
    %cst_65 = arith.constant dense<0.000000e+00> : vector<8x64xf32>
    %136 = tpu.matmul %133, %135, %cst_65 {dimension_numbers = #tpu.dot_dimension_numbers<[1], [0], [0], [1], [0, 0, 1, 1], [], []>} : vector<8x32xbf16>, vector<32x64xbf16>, vector<8x64xf32> -> vector<8x64xf32>
    %137 = arith.addf %121, %136 : vector<8x64xf32>
    %c0_66 = arith.constant 0 : index
    %c0_67 = arith.constant 0 : index
    %138 = vector.load %arg7[%c0_66, %c0_67] : memref<1x64xf32, #tpu.memory_space<vmem>>, vector<1x64xf32>
    %139 = vector.broadcast %138 : vector<1x64xf32> to vector<8x64xf32>
    %140 = arith.addf %137, %139 : vector<8x64xf32>
    %cst_68 = arith.constant 0.000000e+00 : f32
    %141 = vector.broadcast %cst_68 : f32 to vector<8x64xf32>
    %142 = arith.maximumf %140, %141 : vector<8x64xf32>
    %c0_69 = arith.constant 0 : index
    %c0_70 = arith.constant 0 : index
    %143 = vector.load %arg8[%c0_69, %c0_70] : memref<64x2xf32, #tpu.memory_space<vmem>>, vector<64x2xf32>
    %cst_71 = arith.constant dense<0.000000e+00> : vector<8x2xf32>
    %144 = tpu.matmul %142, %143, %cst_71 {dimension_numbers = #tpu.dot_dimension_numbers<[1], [0], [0], [1], [0, 0, 1, 1], [], []>} : vector<8x64xf32>, vector<64x2xf32>, vector<8x2xf32> -> vector<8x2xf32>
    %c0_72 = arith.constant 0 : index
    %c0_73 = arith.constant 0 : index
    %145 = vector.load %arg9[%c0_72, %c0_73] : memref<1x2xf32, #tpu.memory_space<vmem>>, vector<1x2xf32>
    %146 = vector.broadcast %145 : vector<1x2xf32> to vector<8x2xf32>
    %147 = arith.addf %144, %146 : vector<8x2xf32>
    %c0_74 = arith.constant 0 : index
    %c0_75 = arith.constant 0 : index
    %148 = vector.load %arg10[%c0_74, %c0_75] : memref<8x2xf32, #tpu.memory_space<vmem>>, vector<8x2xf32>
    tpu.vector_store %arg10[%c0_74, %c0_75], %147 {strides = array<i32>} : memref<8x2xf32, #tpu.memory_space<vmem>>, vector<8x2xf32>,
    return
  }
  func.func @transform_0(%arg0: i32) -> (i32, i32, i32) {
    %c0_i32 = arith.constant 0 : i32
    %c0_i32_0 = arith.constant 0 : i32
    %c0_i32_1 = arith.constant 0 : i32
    return %arg0, %c0_i32, %c0_i32_0 : i32, i32, i32
  }
  func.func @transform_1(%arg0: i32) -> (i32, i32) {
    %c0_i32 = arith.constant 0 : i32
    %c0_i32_0 = arith.constant 0 : i32
    %c0_i32_1 = arith.constant 0 : i32
    return %c0_i32, %c0_i32_0 : i32, i32
  }
  func.func @transform_2(%arg0: i32) -> (i32, i32) {
    %c0_i32 = arith.constant 0 : i32
    %c0_i32_0 = arith.constant 0 : i32
    %c0_i32_1 = arith.constant 0 : i32
    return %c0_i32, %c0_i32_0 : i32, i32
  }
  func.func @transform_3(%arg0: i32) -> (i32, i32, i32) {
    %c0_i32 = arith.constant 0 : i32
    %c0_i32_0 = arith.constant 0 : i32
    %c0_i32_1 = arith.constant 0 : i32
    %c0_i32_2 = arith.constant 0 : i32
    return %c0_i32, %c0_i32_0, %c0_i32_1 : i32, i32, i32
  }
  func.func @transform_4(%arg0: i32) -> (i32, i32) {
    %c0_i32 = arith.constant 0 : i32
    %c0_i32_0 = arith.constant 0 : i32
    %c0_i32_1 = arith.constant 0 : i32
    return %c0_i32, %c0_i32_0 : i32, i32
  }
  func.func @transform_5(%arg0: i32) -> (i32, i32, i32) {
    %c0_i32 = arith.constant 0 : i32
    %c0_i32_0 = arith.constant 0 : i32
    %c0_i32_1 = arith.constant 0 : i32
    %c0_i32_2 = arith.constant 0 : i32
    return %c0_i32, %c0_i32_0, %c0_i32_1 : i32, i32, i32
  }
  func.func @transform_6(%arg0: i32) -> (i32, i32) {
    %c0_i32 = arith.constant 0 : i32
    %c0_i32_0 = arith.constant 0 : i32
    %c0_i32_1 = arith.constant 0 : i32
    return %c0_i32, %c0_i32_0 : i32, i32
  }
  func.func @transform_7(%arg0: i32) -> (i32, i32) {
    %c0_i32 = arith.constant 0 : i32
    %c0_i32_0 = arith.constant 0 : i32
    %c0_i32_1 = arith.constant 0 : i32
    return %c0_i32, %c0_i32_0 : i32, i32
  }
  func.func @transform_8(%arg0: i32) -> (i32, i32) {
    %c0_i32 = arith.constant 0 : i32
    %c0_i32_0 = arith.constant 0 : i32
    %c0_i32_1 = arith.constant 0 : i32
    return %c0_i32, %c0_i32_0 : i32, i32
  }
  func.func @transform_9(%arg0: i32) -> (i32, i32) {
    %c0_i32 = arith.constant 0 : i32
    %c0_i32_0 = arith.constant 0 : i32
    return %arg0, %c0_i32 : i32, i32
  }
}

</mosaic_0001>

<bundles_post_ra>
// kernel: naive_net_forward.1
= control target key start
LH: loop header
LB: loop body
LE: loop exit
PB: predicated region body
PF: predicated region fallthrough
CT: control target
= control target key end

     0   :  { %vm226_vm0 = vcmask 1040384   ;;  %vm171_vm1 = vcmask 146432   ;;  %vm1403_vm2 = vcmask 392192   ;;  %vm2386_vm3 = vcmask 261120   ;;  %s4401_s1 = inlined_call_operand.vmem [shape: bf16[18,48], index: 1, kind: input, shape index: {}]   ;;  %s4402_s0 = inlined_call_operand.vmem [shape: bf16[1,1152,18], index: 0, kind: input, shape index: {}]   ;;  %s4403_s3 = inlined_call_operand.vmem [shape: bf16[9,48,32], index: 3, kind: input, shape index: {}]   ;;  %s4404_s2 = inlined_call_operand.vmem [shape: f32[1,48], index: 2, kind: input, shape index: {}]   ;;  %s4405_s4 = inlined_call_operand.vmem [shape: f32[1,32], index: 4, kind: input, shape index: {}]   ;;  %s4406_s5 = inlined_call_operand.vmem [shape: bf16[4,32,64], index: 5, kind: input, shape index: {}]   ;;  %s4407_s7 = inlined_call_operand.vmem [shape: f32[64,2], index: 7, kind: input, shape index: {}]   ;;  %s4408_s6 = inlined_call_operand.vmem [shape: f32[1,64], index: 6, kind: input, shape index: {}]   ;;  %s4409_s8 = inlined_call_operand.vmem [shape: f32[1,2], index: 8, kind: input, shape index: {}]   ;;  %s4410_s9 = inlined_call_operand.vmem [shape: f32[8,2], index: 9, kind: output, shape index: {}]  }
   0x1   :  { %v35_v0 = vld [vmem:[%s4401_s1 + $0x8] sm:$0x1]  ;;  %v3227_v4 = vld [vmem:[%s4401_s1] sm:$0xff]  ;;  %v3239_v5 = vld [vmem:[%s4402_s0 + $0x58] sm:$0xff]  ;;  %vm2529_vm4 = vcmask 523264   ;;  %vm2553_vm5 = vcmask 15360  }
   0x2   :  { %v167_v1 = vunpack.c.l.b16 %v35_v0  ;;  %v3240_v6 = vld [vmem:[%s4402_s0 + $0x60] sm:$0xff]  ;;  %v3243_v7 = vld [vmem:[%s4402_s0 + $0x78] sm:$0xff]  ;;  %v3305_v8 = vld [vmem:[%s4403_s3 + $0x28] sm:$0xff] }
   0x3   :  { %v3228_v9 = vld [vmem:[%s4402_s0] sm:$0xff]  ;;  %v3241_v10 = vld [vmem:[%s4402_s0 + $0x68] sm:$0xff]  ;;  %v3246_v11 = vld [vmem:[%s4402_s0 + $0x90] sm:$0xff] }
   0x4   :  { %v169_v2 = vpack.c.b16 %v167_v1, %v167_v1  ;;  %v3244_v12 = vld [vmem:[%s4402_s0 + $0x80] sm:$0xff]  ;;  %v3229_v13 = vld [vmem:[%s4402_s0 + $0x8] sm:$0xff]  ;;  %v3242_v14 = vld [vmem:[%s4402_s0 + $0x70] sm:$0xff] }
   0x5   :  { %v3247_v15 = vld [vmem:[%s4402_s0 + $0x98] sm:$0xff]  ;;  %v3245_v16 = vld [vmem:[%s4402_s0 + $0x88] sm:$0xff]  ;;  %v3230_v17 = vld [vmem:[%s4402_s0 + $0x10] sm:$0xff] }
   0x6   :  { %v228_v3 = vsel %vm226_vm0, %v169_v2, 0  ;;  %v3248_v18 = vld [vmem:[%s4402_s0 + $0xa0] sm:$0xff]  ;;  %v3282_v20 = vld [vmem:[%s4402_s0 + $0x1b0] sm:$0xff]  ;;  %v3231_v21 = vld [vmem:[%s4402_s0 + $0x18] sm:$0xff] }
   0x7   :  { %3335 = vmatpush.bf16.msra.mxu1 %v228_v3  ;;  %3336 = vmatpush.bf16.msra.mxu2 %v228_v3  ;;  %v3264_v19 = vld [vmem:[%s4402_s0 + $0x120] sm:$0xff]  ;;  %v3311_v23 = vld [vmem:[%s4403_s3 + $0x58] sm:$0xff]  ;;  %v3302_v24 = vld [vmem:[%s4403_s3 + $0x10] sm:$0xff] }
   0x8   :  { %3337 = vmatpush.bf16.msra.mxu3 %v228_v3  ;;  %236 = vmatpush.bf16.msra.mxu0 %v228_v3  ;;  %v3308_v22 = vld [vmem:[%s4403_s3 + $0x40] sm:$0xff]  ;;  %v3249_v26 = vld [vmem:[%s4402_s0 + $0xa8] sm:$0xff]  ;;  %v3283_v28 = vld [vmem:[%s4402_s0 + $0x1b8] sm:$0xff] }
   0x9   :  { %v3304_v25 = vld [vmem:[%s4403_s3 + $0x20] sm:$0xff]  ;;  %v3265_v27 = vld [vmem:[%s4402_s0 + $0x128] sm:$0xff]  ;;  %v3250_v30 = vld [vmem:[%s4402_s0 + $0xb0] sm:$0xff] }
   0xa   :  { %v3232_v29 = vld [vmem:[%s4402_s0 + $0x20] sm:$0xff]  ;;  %v3266_v31 = vld [vmem:[%s4402_s0 + $0x130] sm:$0xff]  ;;  %v3233_v33 = vld [vmem:[%s4402_s0 + $0x28] sm:$0xff] }
   0xb   :  { %3338 = vmatpush.bf16.msra.mxu1 %v3227_v4  ;;  %3339 = vmatpush.bf16.msra.mxu2 %v3227_v4  ;;  %v3284_v32 = vld [vmem:[%s4402_s0 + $0x1c0] sm:$0xff]  ;;  %v3251_v34 = vld [vmem:[%s4402_s0 + $0xb8] sm:$0xff]  ;;  %v3285_v36 = vld [vmem:[%s4402_s0 + $0x1c8] sm:$0xff] }
   0xc   :  { %3340 = vmatpush.bf16.msra.mxu3 %v3227_v4  ;;  %237 = vmatpush.bf16.msra.mxu0 %v3227_v4  ;;  %v3267_v35 = vld [vmem:[%s4402_s0 + $0x138] sm:$0xff]  ;;  %v3234_v37 = vld [vmem:[%s4402_s0 + $0x30] sm:$0xff]  ;;  %v3252_v38 = vld [vmem:[%s4402_s0 + $0xc0] sm:$0xff] }
   0xd   :  { %v3268_v39 = vld [vmem:[%s4402_s0 + $0x140] sm:$0xff]  ;;  %v3286_v40 = vld [vmem:[%s4402_s0 + $0x1d0] sm:$0xff]  ;;  %v3235_v41 = vld [vmem:[%s4402_s0 + $0x38] sm:$0xff] }
   0xe   :  { %2646 = vmatmul.msk.bf16.vlgmr.msra.gmra.mxu1 %vm171_vm1, %v3239_v5  ;;  %2647 = vmatmul.msk.bf16.vlgmr.msra.gmra.mxu2 %vm171_vm1, %v3240_v6  ;;  %v3303_v42 = vld [vmem:[%s4403_s3 + $0x18] sm:$0xff]  ;;  %v3253_v43 = vld [vmem:[%s4402_s0 + $0xc8] sm:$0xff]  ;;  %v3236_v47 = vld [vmem:[%s4402_s0 + $0x40] sm:$0xff] }
   0xf   :  { %830 = vmatpush.bf16.msrb.mxu2 %v228_v3  ;;  %515 = vmatpush.bf16.msrb.mxu1 %v228_v3  ;;  %v3269_v44 = vld [vmem:[%s4402_s0 + $0x148] sm:$0xff]  ;;  %v3287_v46 = vld [vmem:[%s4402_s0 + $0x1d8] sm:$0xff]  ;;  %v3254_v55 = vld [vmem:[%s4402_s0 + $0xd0] sm:$0xff] }
  0x10   :  { %1145 = vmatpush.bf16.msrb.mxu3 %v228_v3  ;;  %1442 = vmatpush.bf16.msrb.mxu0 %v3305_v8  ;;  %v3270_v56 = vld [vmem:[%s4402_s0 + $0x150] sm:$0xff]  ;;  %v3288_v58 = vld [vmem:[%s4402_s0 + $0x1e0] sm:$0xff]  ;;  %v3237_v60 = vld [vmem:[%s4402_s0 + $0x48] sm:$0xff] }
  0x11   :  { %2650 = vmatmul.msk.bf16.vlgmr.msra.gmra.mxu3 %vm171_vm1, %v3243_v7  ;;  %2635 = vmatmul.msk.bf16.vlgmr.msra.gmra.mxu0 %vm171_vm1, %v3228_v9  ;;  %v3307_v2 = vld [vmem:[%s4403_s3 + $0x38] sm:$0xff]  ;;  %v3310_v3 = vld [vmem:[%s4403_s3 + $0x50] sm:$0xff] }
  0x12   :  { %v3255_v7 = vld [vmem:[%s4402_s0 + $0xd8] sm:$0xff] }
  0x13   :  { %831 = vmatpush.bf16.msrb.mxu2 %v3227_v4  ;;  %516 = vmatpush.bf16.msrb.mxu1 %v3227_v4  ;;  %v3271_v8 = vld [vmem:[%s4402_s0 + $0x158] sm:$0xff] }
  0x14   :  { %1146 = vmatpush.bf16.msrb.mxu3 %v3227_v4  ;;  %1443 = vmatpush.bf16.msrb.mxu0 %v3304_v25  ;;  %v3301_v4 = vld [vmem:[%s4403_s3 + $0x8] sm:$0xff] }
  0x17   :  { %1638 = vmatpush.bf16.msra.mxu2 %v3308_v22  ;;  %1551 = vmatpush.bf16.msra.mxu1 %v3302_v24  ;;  %v3290_v22 = vld [vmem:[%s4402_s0 + $0x1f0] sm:$0xff] }
  0x18   :  { %1745 = vmatpush.bf16.msra.mxu3 %v3311_v23  ;;  %1444 = vmatpush.bf16.msrb.mxu0 %v3303_v42 }
  0x1b   :  { %1639 = vmatpush.bf16.msra.mxu2 %v3307_v2  ;;  %1552 = vmatpush.bf16.msra.mxu1 %v3301_v4 }
  0x1c   :  { %1746 = vmatpush.bf16.msra.mxu3 %v3310_v3 }
  0x1e   :  { %2648 = vmatmul.msk.bf16.gmra.mxu2 %vm171_vm1, %v3241_v10  ;;  %2725 = vmatmul.msk.bf16.vlgmr.msrb.gmra.mxu1 %vm171_vm1, %v3246_v11  ;;  %v3289_v10 = vld [vmem:[%s4402_s0 + $0x1e8] sm:$0xff]  ;;  %v3238_v11 = vld [vmem:[%s4402_s0 + $0x50] sm:$0xff] }
  0x21   :  { %2651 = vmatmul.msk.bf16.gmra.mxu3 %vm171_vm1, %v3244_v12  ;;  %2636 = vmatmul.msk.bf16.gmra.mxu0 %vm171_vm1, %v3229_v13 }
  0x2e   :  { %2649 = vmatmul.msk.bf16.gmra.mxu2 %vm171_vm1, %v3242_v14  ;;  %2726 = vmatmul.msk.bf16.gmra.mxu1 %vm171_vm1, %v3247_v15 }
  0x31   :  { %2652 = vmatmul.msk.bf16.gmra.mxu3 %vm171_vm1, %v3245_v16  ;;  %2637 = vmatmul.msk.bf16.gmra.mxu0 %vm171_vm1, %v3230_v17 }
  0x3e   :  { %2727 = vmatmul.msk.bf16.gmra.mxu1 %vm171_vm1, %v3248_v18  ;;  %2815 = vmatmul.msk.bf16.vlgmr.msrb.gmra.mxu2 %vm171_vm1, %v3264_v19  ;;  %v3256_v19 = vld [vmem:[%s4402_s0 + $0xe0] sm:$0xff] }
  0x41   :  { %2905 = vmatmul.msk.bf16.vlgmr.msrb.gmra.mxu3 %vm171_vm1, %v3282_v20  ;;  %2638 = vmatmul.msk.bf16.gmra.mxu0 %vm171_vm1, %v3231_v21  ;;  %v3272_v20 = vld [vmem:[%s4402_s0 + $0x160] sm:$0xff] }
  0x4e   :  { %2728 = vmatmul.msk.bf16.gmra.mxu1 %vm171_vm1, %v3249_v26  ;;  %2816 = vmatmul.msk.bf16.gmra.mxu2 %vm171_vm1, %v3265_v27  ;;  %v3314_v27 = vld [vmem:[%s4403_s3 + $0x70] sm:$0xff] }
  0x4f   :  { %1856 = vmatpush.bf16.msra.mxu0 %v3314_v27 }
  0x51   :  { %2906 = vmatmul.msk.bf16.gmra.mxu3 %vm171_vm1, %v3283_v28  ;;  %2639 = vmatmul.msk.bf16.gmra.mxu0 %vm171_vm1, %v3232_v29 }
  0x5e   :  { %2729 = vmatmul.msk.bf16.gmra.mxu1 %vm171_vm1, %v3250_v30  ;;  %2817 = vmatmul.msk.bf16.gmra.mxu2 %vm171_vm1, %v3266_v31 }
  0x61   :  { %2907 = vmatmul.msk.bf16.gmra.mxu3 %vm171_vm1, %v3284_v32  ;;  %2640 = vmatmul.msk.bf16.gmra.mxu0 %vm171_vm1, %v3233_v33  ;;  %v3666_v32 = vld [vmem:[%s4404_s2] ss:$0 sm:$0xff] }
  0x6e   :  { %2730 = vmatmul.msk.bf16.gmra.mxu1 %vm171_vm1, %v3251_v34  ;;  %2818 = vmatmul.msk.bf16.gmra.mxu2 %vm171_vm1, %v3267_v35 }
  0x71   :  { %2908 = vmatmul.msk.bf16.gmra.mxu3 %vm171_vm1, %v3285_v36  ;;  %2641 = vmatmul.msk.bf16.gmra.mxu0 %vm171_vm1, %v3234_v37  ;;  %v3257_v36 = vld [vmem:[%s4402_s0 + $0xe8] sm:$0xff] }
  0x72   :  { %v3273_v37 = vld [vmem:[%s4402_s0 + $0x168] sm:$0xff] }
  0x7e   :  { %2731 = vmatmul.msk.bf16.gmra.mxu1 %vm171_vm1, %v3252_v38  ;;  %2819 = vmatmul.msk.bf16.gmra.mxu2 %vm171_vm1, %v3268_v39  ;;  %v3291_v39 = vld [vmem:[%s4402_s0 + $0x1f8] sm:$0xff] }
  0x81   :  { %2909 = vmatmul.msk.bf16.gmra.mxu3 %vm171_vm1, %v3286_v40  ;;  %2642 = vmatmul.msk.bf16.gmra.mxu0 %vm171_vm1, %v3235_v41 }
  0x8b   :  { %v3553_v45 = vpop.f32.mrf.mxu1 }
  0x8e   :  { %2732 = vmatmul.msk.bf16.gmra.mxu1 %vm171_vm1, %v3253_v43  ;;  %2820 = vmatmul.msk.bf16.gmra.mxu2 %vm171_vm1, %v3269_v44  ;;  %v239_v48 = vpop.f32.mrf.mxu0 }
  0x91   :  { %2910 = vmatmul.msk.bf16.gmra.mxu3 %vm171_vm1, %v3287_v46  ;;  %v3564_v49 = vpop.f32.mrf.mxu2  ;;  %2643 = vmatmul.msk.bf16.gmra.mxu0 %vm171_vm1, %v3236_v47 }
  0x93   :  { %v3569_v51 = vpop.f32.mrf.mxu1 }
  0x94   :  { %v3566_v50 = vpop.f32.mrf.mxu3 }
  0x96   :  { %v241_v52 = vpop.f32.mrf.mxu0 }
  0x99   :  { %v3571_v53 = vpop.f32.mrf.mxu2 }
  0x9b   :  { %v518_v57 = vpop.f32.mrf.mxu1 }
  0x9c   :  { %v3573_v54 = vpop.f32.mrf.mxu3  ;;  %v608_v59 = vmax.f32 %v239_v48, %v518_v57 }
  0x9e   :  { %2733 = vmatmul.msk.bf16.gmra.mxu1 %vm171_vm1, %v3254_v55  ;;  %2821 = vmatmul.msk.bf16.gmra.mxu2 %vm171_vm1, %v3270_v56  ;;  %v3590_v61 = vpop.f32.mrf.mxu0 }
  0xa1   :  { %2911 = vmatmul.msk.bf16.gmra.mxu3 %vm171_vm1, %v3288_v58  ;;  %v3592_v62 = vpop.f32.mrf.mxu2  ;;  %2644 = vmatmul.msk.bf16.gmra.mxu0 %vm171_vm1, %v3237_v60 }
  0xa3   :  { %v520_v0 = vpop.f32.mrf.mxu1 }
  0xa4   :  { %v3594_v63 = vpop.f32.mrf.mxu3  ;;  %v609_v31 = vmax.f32 %v241_v52, %v520_v0 }
  0xa6   :  { %v3597_v1 = vpop.f32.mrf.mxu0 }
  0xa9   :  { %v3608_v5 = vpop.f32.mrf.mxu2 }
  0xab   :  { %v523_v9 = vpop.f32.mrf.mxu1 }
  0xac   :  { %v3610_v6 = vpop.f32.mrf.mxu3  ;;  %v610_v44 = vmax.f32 %v3590_v61, %v523_v9  ;;  %v3274_v9 = vld [vmem:[%s4402_s0 + $0x170] sm:$0xff] }
  0xae   :  { %2734 = vmatmul.msk.bf16.gmra.mxu1 %vm171_vm1, %v3255_v7  ;;  %2822 = vmatmul.msk.bf16.gmra.mxu2 %vm171_vm1, %v3271_v8  ;;  %v3627_v12 = vpop.f32.mrf.mxu0  ;;  %v3258_v8 = vld [vmem:[%s4402_s0 + $0xf0] sm:$0xff] }
  0xb1   :  { %2912 = vmatmul.msk.bf16.gmra.mxu3 %vm171_vm1, %v3289_v10  ;;  %v3629_v13 = vpop.f32.mrf.mxu2  ;;  %2645 = vmatmul.msk.bf16.gmra.mxu0 %vm171_vm1, %v3238_v11 }
  0xb3   :  { %v525_v15 = vpop.f32.mrf.mxu1 }
  0xb4   :  { %v3631_v14 = vpop.f32.mrf.mxu3  ;;  %v611_v60 = vmax.f32 %v3597_v1, %v525_v15  ;;  %v3292_v1 = vld [vmem:[%s4402_s0 + $0x200] sm:$0xff] }
  0xb6   :  { %v3634_v16 = vpop.f32.mrf.mxu0 }
  0xb9   :  { %v3636_v17 = vpop.f32.mrf.mxu2 }
  0xbb   :  { %v3646_v21 = vpop.f32.mrf.mxu1 }
  0xbc   :  { %v3638_v18 = vpop.f32.mrf.mxu3 }
  0xbe   :  { %2735 = vmatmul.msk.bf16.gmra.mxu1 %vm171_vm1, %v3256_v19  ;;  %2823 = vmatmul.msk.bf16.gmra.mxu2 %vm171_vm1, %v3272_v20  ;;  %v3654_v23 = vpop.f32.mrf.mxu0  ;;  %v612_v19 = vmax.f32 %v3627_v12, %v3646_v21 }
  0xc1   :  { %2913 = vmatmul.msk.bf16.gmra.mxu3 %vm171_vm1, %v3290_v22  ;;  %v833_v24 = vpop.f32.mrf.mxu2 }
  0xc2   :  { %v923_v25 = vmax.f32 %v608_v59, %v833_v24 }
  0xc3   :  { %v3659_v28 = vpop.f32.mrf.mxu1 }
  0xc4   :  { %v1148_v26 = vpop.f32.mrf.mxu3 }
  0xc5   :  { %v1238_v29 = vmax.f32 %v923_v25, %v1148_v26 }
  0xc6   :  { %v3661_v30 = vpop.f32.mrf.mxu0 }
  0xc7   :  { %v1278_v40 = vadd.f32 %v3666_v32, %v1238_v29 }
  0xc9   :  { %v835_v33 = vpop.f32.mrf.mxu2  ;;  %v1314_v46 = vmax.f32 %v1278_v40, 0.0  ;;  %v3275_v40 = vld [vmem:[%s4402_s0 + $0x178] sm:$0xff] }
  0xca   :  { %v924_v34 = vmax.f32 %v609_v31, %v835_v33 }
  0xcb   :  { %v3674_v38 = vpop.f32.mrf.mxu1 }
  0xcc   :  { %v1150_v35 = vpop.f32.mrf.mxu3 }
  0xcd   :  { %v1239_v41 = vmax.f32 %v924_v34, %v1150_v35  ;;  %v613_v34 = vmax.f32 %v3634_v16, %v3659_v28 }
  0xce   :  { %2736 = vmatmul.msk.bf16.gmra.mxu1 %vm171_vm1, %v3257_v36  ;;  %2824 = vmatmul.msk.bf16.gmra.mxu2 %vm171_vm1, %v3273_v37  ;;  %v3684_v43 = vpop.f32.mrf.mxu0 }
  0xcf   :  { %v1279_v42 = vadd.f32 %v3666_v32, %v1239_v41 }
  0xd1   :  { %2914 = vmatmul.msk.bf16.gmra.mxu3 %vm171_vm1, %v3291_v39  ;;  %v1315_v47 = vmax.f32 %v1279_v42, 0.0  ;;  %v838_v48 = vpop.f32.mrf.mxu2  ;;  %v3259_v39 = vld [vmem:[%s4402_s0 + $0xf8] sm:$0xff]  ;;  %v3293_v42 = vld [vmem:[%s4402_s0 + $0x208] sm:$0xff] }
  0xd2   :  { %v925_v55 = vmax.f32 %v610_v44, %v838_v48 }
  0xd3   :  { %v3687_v52 = vpack.c.bf16 %v1315_v47, %v1314_v46  ;;  %v3689_v57 = vpop.f32.mrf.mxu1  ;;  %v614_v46 = vmax.f32 %v3654_v23, %v3674_v38 }
  0xd4   :  { %v1153_v56 = vpop.f32.mrf.mxu3 }
  0xd5   :  { %v1240_v58 = vmax.f32 %v925_v55, %v1153_v56 }
  0xd6   :  { %v3693_v3 = vpop.f32.mrf.mxu0 }
  0xd7   :  { %v1280_v59 = vadd.f32 %v3666_v32, %v1240_v58 }
  0xd9   :  { %v1316_v0 = vmax.f32 %v1280_v59, 0.0  ;;  %v840_v2 = vpop.f32.mrf.mxu2 }
  0xda   :  { %v926_v4 = vmax.f32 %v611_v60, %v840_v2 }
  0xdb   :  { %v1367_v61 = vpack.c.bf16 %v1316_v0, %v1315_v47  ;;  %v3701_v10 = vpop.f32.mrf.mxu1 }
  0xdc   :  { %v1155_v7 = vpop.f32.mrf.mxu3 }
  0xdd   :  { %v1241_v11 = vmax.f32 %v926_v4, %v1155_v7  ;;  %2941 = vmatmul.msk.bf16.vlgmr.msrb.gmra.mxu0 %vm1403_vm2, %v1367_v61  ;;  %v615_v61 = vmax.f32 %v3661_v30, %v3689_v57  ;;  %v3294_v30 = vld [vmem:[%s4402_s0 + $0x210] sm:$0xff] }
  0xde   :  { %2737 = vmatmul.msk.bf16.gmra.mxu1 %vm171_vm1, %v3258_v8  ;;  %2825 = vmatmul.msk.bf16.gmra.mxu2 %vm171_vm1, %v3274_v9  ;;  %v3717_v29 = vpop.f32.mrf.mxu0  ;;  %v3260_v9 = vld [vmem:[%s4402_s0 + $0x100] sm:$0xff] }
  0xdf   :  { %v1281_v15 = vadd.f32 %v3666_v32, %v1241_v11  ;;  %v3313_v11 = vld [vmem:[%s4403_s3 + $0x68] sm:$0xff] }
  0xe0   :  { %1857 = vmatpush.bf16.msra.mxu0 %v3313_v11 }
  0xe1   :  { %2915 = vmatmul.msk.bf16.gmra.mxu3 %vm171_vm1, %v3292_v1  ;;  %v1317_v20 = vmax.f32 %v1281_v15, 0.0  ;;  %v843_v22 = vpop.f32.mrf.mxu2  ;;  %v3276_v1 = vld [vmem:[%s4402_s0 + $0x180] sm:$0xff] }
  0xe2   :  { %v927_v25 = vmax.f32 %v612_v19, %v843_v22 }
  0xe3   :  { %v3713_v24 = vpack.c.bf16 %v1317_v20, %v1316_v0  ;;  %v3715_v27 = vpop.f32.mrf.mxu1 }
  0xe4   :  { %v1158_v26 = vpop.f32.mrf.mxu3 }
  0xe5   :  { %v1242_v31 = vmax.f32 %v927_v25, %v1158_v26 }
  0xe6   :  { %v3734_v28 = vpop.f32.mrf.mxu0 }
  0xe7   :  { %v1282_v33 = vadd.f32 %v3666_v32, %v1242_v31 }
  0xe9   :  { %v1318_v35 = vmax.f32 %v1282_v33, 0.0  ;;  %v845_v36 = vpop.f32.mrf.mxu2 }
  0xea   :  { %v928_v12 = vmax.f32 %v613_v34, %v845_v36 }
  0xeb   :  { %v1368_v37 = vpack.c.bf16 %v1318_v35, %v1317_v20  ;;  %v3728_v41 = vpop.f32.mrf.mxu1  ;;  %v616_v20 = vmax.f32 %v3684_v43, %v3701_v10  ;;  %v3261_v43 = vld [vmem:[%s4402_s0 + $0x108] sm:$0xff] }
  0xec   :  { %v1160_v21 = vpop.f32.mrf.mxu3  ;;  %v3277_v10 = vld [vmem:[%s4402_s0 + $0x188] sm:$0xff] }
  0xed   :  { %v1243_v16 = vmax.f32 %v928_v12, %v1160_v21  ;;  %2942 = vmatmul.msk.bf16.gmra.mxu0 %vm1403_vm2, %v1368_v37  ;;  %v617_v12 = vmax.f32 %v3693_v3, %v3715_v27  ;;  %v3309_v3 = vld [vmem:[%s4403_s3 + $0x48] sm:$0xff]  ;;  %v3300_v27 = vld [vmem:[%s4403_s3] sm:$0xff] }
  0xee   :  { %2738 = vmatmul.msk.bf16.gmra.mxu1 %vm171_vm1, %v3259_v39  ;;  %2826 = vmatmul.msk.bf16.gmra.mxu2 %vm171_vm1, %v3275_v40  ;;  %v3747_v2 = vpop.f32.mrf.mxu0 }
  0xef   :  { %v1283_v44 = vadd.f32 %v3666_v32, %v1243_v16  ;;  %1747 = vmatpush.bf16.msra.mxu3 %v3309_v3  ;;  %1553 = vmatpush.bf16.msra.mxu1 %v3300_v27 }
  0xf1   :  { %2916 = vmatmul.msk.bf16.gmra.mxu3 %vm171_vm1, %v3293_v42  ;;  %v1319_v47 = vmax.f32 %v1283_v44, 0.0  ;;  %v848_v48 = vpop.f32.mrf.mxu2  ;;  %v3306_v44 = vld [vmem:[%s4403_s3 + $0x30] sm:$0xff] }
  0xf2   :  { %v929_v56 = vmax.f32 %v614_v46, %v848_v48  ;;  %1640 = vmatpush.bf16.msra.mxu2 %v3306_v44 }
  0xf3   :  { %v3742_v55 = vpack.c.bf16 %v1319_v47, %v1318_v35  ;;  %v3744_v59 = vpop.f32.mrf.mxu1 }
  0xf4   :  { %v1163_v58 = vpop.f32.mrf.mxu3  ;;  %v619_v11 = vmax.f32 %v3734_v28, %v3744_v59  ;;  %v3296_v28 = vld [vmem:[%s4402_s0 + $0x220] sm:$0xff] }
  0xf5   :  { %v1244_v60 = vmax.f32 %v929_v56, %v1163_v58 }
  0xf6   :  { %v3772_v26 = vpop.f32.mrf.mxu0 }
  0xf7   :  { %v1284_v0 = vadd.f32 %v3666_v32, %v1244_v60  ;;  %v618_v60 = vmax.f32 %v3717_v29, %v3728_v41  ;;  %v3262_v41 = vld [vmem:[%s4402_s0 + $0x110] sm:$0xff] }
  0xf9   :  { %v1320_v4 = vmax.f32 %v1284_v0, 0.0  ;;  %v850_v7 = vpop.f32.mrf.mxu2 }
  0xfa   :  { %v930_v23 = vmax.f32 %v615_v61, %v850_v7 }
  0xfb   :  { %v1369_v8 = vpack.c.bf16 %v1320_v4, %v1319_v47  ;;  %v3760_v15 = vpop.f32.mrf.mxu1  ;;  %v3295_v47 = vld [vmem:[%s4402_s0 + $0x218] sm:$0xff] }
  0xfc   :  { %v1165_v38 = vpop.f32.mrf.mxu3 }
  0xfd   :  { %v1245_v57 = vmax.f32 %v930_v23, %v1165_v38  ;;  %2943 = vmatmul.msk.bf16.gmra.mxu0 %vm1403_vm2, %v1369_v8 }
  0xfe   :  { %2739 = vmatmul.msk.bf16.gmra.mxu1 %vm171_vm1, %v3260_v9  ;;  %2827 = vmatmul.msk.bf16.gmra.mxu2 %vm171_vm1, %v3276_v1  ;;  %v3803_v48 = vpop.f32.mrf.mxu0 }
  0xff   :  { %v1285_v19 = vadd.f32 %v3666_v32, %v1245_v57 }
 0x101   :  { %2917 = vmatmul.msk.bf16.gmra.mxu3 %vm171_vm1, %v3294_v30  ;;  %v1321_v22 = vmax.f32 %v1285_v19, 0.0  ;;  %v853_v25 = vpop.f32.mrf.mxu2 }
 0x102   :  { %v931_v33 = vmax.f32 %v616_v20, %v853_v25 }
 0x103   :  { %v3774_v31 = vpack.c.bf16 %v1321_v22, %v1320_v4  ;;  %v3776_v35 = vpop.f32.mrf.mxu1 }
 0x104   :  { %v1168_v34 = vpop.f32.mrf.mxu3  ;;  %v621_v44 = vmax.f32 %v3772_v26, %v3776_v35  ;;  %v3297_v26 = vld [vmem:[%s4402_s0 + $0x228] sm:$0xff] }
 0x105   :  { %v1246_v36 = vmax.f32 %v931_v33, %v1168_v34 }
 0x106   :  { %v276_v9 = vpop.f32.mrf.mxu0 }
 0x107   :  { %v1286_v37 = vadd.f32 %v3666_v32, %v1246_v36  ;;  %v620_v36 = vmax.f32 %v3747_v2, %v3760_v15 }
 0x109   :  { %v1322_v21 = vmax.f32 %v1286_v37, 0.0  ;;  %v855_v39 = vpop.f32.mrf.mxu2 }
 0x10a   :  { %v932_v42 = vmax.f32 %v617_v12, %v855_v39 }
 0x10b   :  { %v3787_v40 = vpack.c.bf16 %v1322_v21, %v1321_v22  ;;  %v3798_v46 = vpop.f32.mrf.mxu1  ;;  %v3278_v22 = vld [vmem:[%s4402_s0 + $0x190] sm:$0xff] }
 0x10c   :  { %v1170_v16 = vpop.f32.mrf.mxu3 }
 0x10d   :  { %v1247_v56 = vmax.f32 %v932_v42, %v1170_v16  ;;  %2944 = vmatmul.msk.bf16.gmra.mxu0 %vm1403_vm2, %v3787_v40 }
 0x10e   :  { %2740 = vmatmul.msk.bf16.gmra.mxu1 %vm171_vm1, %v3261_v43  ;;  %2828 = vmatmul.msk.bf16.gmra.mxu2 %vm171_vm1, %v3277_v10  ;;  %v279_v34 = vpop.f32.mrf.mxu0 }
 0x10f   :  { %v1287_v58 = vadd.f32 %v3666_v32, %v1247_v56 }
 0x111   :  { %2918 = vmatmul.msk.bf16.gmra.mxu3 %vm171_vm1, %v3295_v47  ;;  %v1323_v0 = vmax.f32 %v1287_v58, 0.0  ;;  %v858_v61 = vpop.f32.mrf.mxu2  ;;  %v3263_v58 = vld [vmem:[%s4402_s0 + $0x118] sm:$0xff] }
 0x112   :  { %v933_v7 = vmax.f32 %v618_v60, %v858_v61  ;;  %v3279_v60 = vld [vmem:[%s4402_s0 + $0x198] sm:$0xff] }
 0x113   :  { %v3813_v4 = vpack.c.bf16 %v1323_v0, %v1322_v21  ;;  %v555_v23 = vpop.f32.mrf.mxu1 }
 0x114   :  { %v1173_v8 = vpop.f32.mrf.mxu3 }
 0x115   :  { %v1248_v38 = vmax.f32 %v933_v7, %v1173_v8  ;;  %v622_v7 = vmax.f32 %v3803_v48, %v3798_v46  ;;  %v3280_v46 = vld [vmem:[%s4402_s0 + $0x1a0] sm:$0xff] }
 0x116   :  { %v281_v27 = vpop.f32.mrf.mxu0  ;;  %v3312_v48 = vld [vmem:[%s4403_s3 + $0x60] sm:$0xff] }
 0x117   :  { %v1288_v1 = vadd.f32 %v3666_v32, %v1248_v38  ;;  %1858 = vmatpush.bf16.msra.mxu0 %v3312_v48 }
 0x119   :  { %v1324_v30 = vmax.f32 %v1288_v1, 0.0  ;;  %v860_v57 = vpop.f32.mrf.mxu2 }
 0x11a   :  { %v934_v20 = vmax.f32 %v619_v11, %v860_v57 }
 0x11b   :  { %v3818_v19 = vpack.c.bf16 %v1324_v30, %v1323_v0  ;;  %v3826_v25 = vpop.f32.mrf.mxu1 }
 0x11c   :  { %v1175_v29 = vpop.f32.mrf.mxu3 }
 0x11d   :  { %v1249_v59 = vmax.f32 %v934_v20, %v1175_v29  ;;  %2945 = vmatmul.msk.bf16.gmra.mxu0 %vm1403_vm2, %v3818_v19 }
 0x11e   :  { %2741 = vmatmul.msk.bf16.gmra.mxu1 %vm171_vm1, %v3262_v41  ;;  %2829 = vmatmul.msk.bf16.gmra.mxu2 %vm171_vm1, %v3278_v22  ;;  %v284_v57 = vpop.f32.mrf.mxu0  ;;  %v623_v22 = vmax.f32 %v276_v9, %v555_v23  ;;  %v3298_v23 = vld [vmem:[%s4402_s0 + $0x230] sm:$0xff] }
 0x11f   :  { %v1289_v33 = vadd.f32 %v3666_v32, %v1249_v59 }
 0x121   :  { %2919 = vmatmul.msk.bf16.gmra.mxu3 %vm171_vm1, %v3296_v28  ;;  %v1325_v37 = vmax.f32 %v1289_v33, 0.0  ;;  %v863_v12 = vpop.f32.mrf.mxu2 }
 0x122   :  { %v935_v39 = vmax.f32 %v620_v36, %v863_v12 }
 0x123   :  { %v3839_v21 = vpack.c.bf16 %v1325_v37, %v1324_v30  ;;  %v3841_v10 = vpop.f32.mrf.mxu1 }
 0x124   :  { %v1178_v43 = vpop.f32.mrf.mxu3 }
 0x125   :  { %v1250_v42 = vmax.f32 %v935_v39, %v1178_v43 }
 0x126   :  { %v286_v39 = vpop.f32.mrf.mxu0 }
 0x127   :  { %v1290_v16 = vadd.f32 %v3666_v32, %v1250_v42  ;;  %v624_v42 = vmax.f32 %v279_v34, %v3826_v25  ;;  %v3281_v25 = vld [vmem:[%s4402_s0 + $0x1a8] sm:$0xff] }
 0x129   :  { %v1326_v3 = vmax.f32 %v1290_v16, 0.0  ;;  %v865_v47 = vpop.f32.mrf.mxu2 }
 0x12a   :  { %v936_v2 = vmax.f32 %v621_v44, %v865_v47 }
 0x12b   :  { %v3846_v56 = vpack.c.bf16 %v1326_v3, %v1325_v37  ;;  %v3854_v0 = vpop.f32.mrf.mxu1 }
 0x12c   :  { %v1180_v15 = vpop.f32.mrf.mxu3 }
 0x12d   :  { %v1251_v35 = vmax.f32 %v936_v2, %v1180_v15  ;;  %2946 = vmatmul.msk.bf16.gmra.mxu0 %vm1403_vm2, %v3846_v56 }
 0x12e   :  { %2742 = vmatmul.msk.bf16.gmra.mxu1 %vm171_vm1, %v3263_v58  ;;  %2830 = vmatmul.msk.bf16.gmra.mxu2 %vm171_vm1, %v3279_v60 }
 0x12f   :  { %v1291_v61 = vadd.f32 %v3666_v32, %v1251_v35  ;;  %v625_v35 = vmax.f32 %v281_v27, %v3841_v10  ;;  %v626_v27 = vmax.f32 %v284_v57, %v3854_v0 }
 0x131   :  { %2920 = vmatmul.msk.bf16.gmra.mxu3 %vm171_vm1, %v3297_v26  ;;  %v1327_v8 = vmax.f32 %v1291_v61, 0.0  ;;  %v868_v38 = vpop.f32.mrf.mxu2  ;;  %v289_v26 = vpop.f32.mrf.mxu0 }
 0x132   :  { %v937_v11 = vmax.f32 %v622_v7, %v868_v38 }
 0x133   :  { %v3867_v1 = vpack.c.bf16 %v1327_v8, %v1326_v3  ;;  %v565_v20 = vpop.f32.mrf.mxu1 }
 0x134   :  { %v1183_v30 = vpop.f32.mrf.mxu3 }
 0x135   :  { %v1252_v29 = vmax.f32 %v937_v11, %v1183_v30  ;;  %v3299_v11 = vld [vmem:[%s4402_s0 + $0x238] sm:$0xff] }
 0x137   :  { %v1292_v41 = vadd.f32 %v3666_v32, %v1252_v29 }
 0x139   :  { %v1328_v28 = vmax.f32 %v1292_v41, 0.0  ;;  %v870_v59 = vpop.f32.mrf.mxu2  ;;  %v291_v41 = vpop.f32.mrf.mxu0 }
 0x13a   :  { %v938_v36 = vmax.f32 %v623_v22, %v870_v59 }
 0x13b   :  { %v3870_v33 = vpack.c.bf16 %v1328_v28, %v1327_v8  ;;  %v3878_v12 = vpop.f32.mrf.mxu1 }
 0x13c   :  { %v1185_v37 = vpop.f32.mrf.mxu3 }
 0x13d   :  { %v1253_v9 = vmax.f32 %v938_v36, %v1185_v37  ;;  %2947 = vmatmul.msk.bf16.gmra.mxu0 %vm1403_vm2, %v3870_v33 }
 0x13e   :  { %2831 = vmatmul.msk.bf16.gmra.mxu2 %vm171_vm1, %v3280_v46  ;;  %2964 = vmatmul.msk.bf16.vlgmr.msra.gmra.mxu1 %vm1403_vm2, %v3687_v52 }
 0x13f   :  { %v1293_v43 = vadd.f32 %v3666_v32, %v1253_v9 }
 0x141   :  { %2921 = vmatmul.msk.bf16.gmra.mxu3 %vm171_vm1, %v3298_v23  ;;  %v1329_v16 = vmax.f32 %v1293_v43, 0.0  ;;  %v873_v44 = vpop.f32.mrf.mxu2  ;;  %v627_v23 = vmax.f32 %v286_v39, %v565_v20  ;;  %v628_v20 = vmax.f32 %v289_v26, %v3878_v12 }
 0x142   :  { %v939_v47 = vmax.f32 %v624_v42, %v873_v44 }
 0x143   :  { %v3891_v3 = vpack.c.bf16 %v1329_v16, %v1328_v28  ;;  %v570_v15 = vpop.f32.mrf.mxu1 }
 0x144   :  { %v1188_v2 = vpop.f32.mrf.mxu3 }
 0x145   :  { %v1254_v58 = vmax.f32 %v939_v47, %v1188_v2 }
 0x147   :  { %v1294_v60 = vadd.f32 %v3666_v32, %v1254_v58 }
 0x149   :  { %v1330_v61 = vmax.f32 %v1294_v60, 0.0  ;;  %v875_v7 = vpop.f32.mrf.mxu2 }
 0x14a   :  { %v940_v8 = vmax.f32 %v625_v35, %v875_v7 }
 0x14b   :  { %v3895_v52 = vpack.c.bf16 %v1330_v61, %v1329_v16  ;;  %v3900_v34 = vpop.f32.mrf.mxu1 }
 0x14c   :  { %v1190_v38 = vpop.f32.mrf.mxu3 }
 0x14d   :  { %v1255_v30 = vmax.f32 %v940_v8, %v1190_v38  ;;  %2948 = vmatmul.msk.bf16.gmra.mxu0 %vm1403_vm2, %v3895_v52 }
 0x14e   :  { %2832 = vmatmul.msk.bf16.gmra.mxu2 %vm171_vm1, %v3281_v25  ;;  %2965 = vmatmul.msk.bf16.gmra.mxu1 %vm1403_vm2, %v3713_v24 }
 0x14f   :  { %v1295_v10 = vadd.f32 %v3666_v32, %v1255_v30 }
 0x151   :  { %2922 = vmatmul.msk.bf16.gmra.mxu3 %vm171_vm1, %v3299_v11  ;;  %v1331_v29 = vmax.f32 %v1295_v10, 0.0  ;;  %v878_v22 = vpop.f32.mrf.mxu2  ;;  %v629_v11 = vmax.f32 %v291_v41, %v570_v15  ;;  %v3317_v15 = vld [vmem:[%s4403_s3 + $0x88] sm:$0xff] }
 0x152   :  { %v941_v59 = vmax.f32 %v626_v27, %v878_v22  ;;  %v3323_v22 = vld [vmem:[%s4403_s3 + $0xb8] sm:$0xff]  ;;  %1959 = vmatpush.bf16.msrb.mxu1 %v3317_v15 }
 0x153   :  { %v3913_v28 = vpack.c.bf16 %v1331_v29, %v1330_v61  ;;  %v3915_v37 = vpop.f32.mrf.mxu1  ;;  %2177 = vmatpush.bf16.msrb.mxu3 %v3323_v22 }
 0x154   :  { %v1193_v36 = vpop.f32.mrf.mxu3 }
 0x155   :  { %v1256_v46 = vmax.f32 %v941_v59, %v1193_v36 }
 0x157   :  { %v1296_v48 = vadd.f32 %v3666_v32, %v1256_v46  ;;  %v630_v46 = vmax.f32 %v3553_v45, %v3900_v34  ;;  %v631_v45 = vmax.f32 %v3569_v51, %v3915_v37 }
 0x159   :  { %v1332_v9 = vmax.f32 %v1296_v48, 0.0  ;;  %v880_v43 = vpop.f32.mrf.mxu2 }
 0x15a   :  { %v3918_v42 = vpop.f32.mrf.mxu0  ;;  %v942_v0 = vmax.f32 %v627_v23, %v880_v43 }
 0x15b   :  { %v3920_v16 = vpack.c.bf16 %v1332_v9, %v1331_v29  ;;  %v3922_v44 = vpop.f32.mrf.mxu1  ;;  %v3320_v29 = vld [vmem:[%s4403_s3 + $0xa0] sm:$0xff] }
 0x15c   :  { %v1195_v57 = vpop.f32.mrf.mxu3  ;;  %2066 = vmatpush.bf16.msrb.mxu2 %v3320_v29  ;;  %v632_v51 = vmax.f32 %v3564_v49, %v3922_v44 }
 0x15d   :  { %v1257_v47 = vmax.f32 %v942_v0, %v1195_v57  ;;  %2949 = vmatmul.msk.bf16.gmra.mxu0 %vm1403_vm2, %v3920_v16 }
 0x15e   :  { %2966 = vmatmul.msk.bf16.gmra.mxu1 %vm1403_vm2, %v3742_v55  ;;  %2993 = vmatmul.msk.bf16.vlgmr.msra.gmra.mxu2 %vm1403_vm2, %v3713_v24 }
 0x15f   :  { %v1297_v2 = vadd.f32 %v3666_v32, %v1257_v47  ;;  %v3326_v47 = vld [vmem:[%s4403_s3 + $0xd0] sm:$0xff] }
 0x160   :  { %2280 = vmatpush.bf16.msrb.mxu0 %v3326_v47 }
 0x161   :  { %3022 = vmatmul.msk.bf16.vlgmr.msra.gmra.mxu3 %vm1403_vm2, %v3774_v31  ;;  %v1333_v39 = vmax.f32 %v1297_v2, 0.0  ;;  %v883_v58 = vpop.f32.mrf.mxu2 }
 0x162   :  { %v3934_v60 = vpop.f32.mrf.mxu0  ;;  %v943_v61 = vmax.f32 %v628_v20, %v883_v58 }
 0x163   :  { %v3936_v35 = vpack.c.bf16 %v1333_v39, %v1332_v9  ;;  %v3938_v8 = vpop.f32.mrf.mxu1 }
 0x164   :  { %v1198_v7 = vpop.f32.mrf.mxu3 }
 0x165   :  { %v1258_v38 = vmax.f32 %v943_v61, %v1198_v7 }
 0x167   :  { %v1298_v25 = vadd.f32 %v3666_v32, %v1258_v38 }
 0x169   :  { %v1334_v24 = vmax.f32 %v1298_v25, 0.0  ;;  %v885_v30 = vpop.f32.mrf.mxu2 }
 0x16a   :  { %v3941_v10 = vpop.f32.mrf.mxu0  ;;  %v944_v12 = vmax.f32 %v629_v11, %v885_v30 }
 0x16b   :  { %v3943_v27 = vpack.c.bf16 %v1334_v24, %v1333_v39  ;;  %v3954_v41 = vpop.f32.mrf.mxu1 }
 0x16c   :  { %v1200_v26 = vpop.f32.mrf.mxu3 }
 0x16d   :  { %v1259_v59 = vmax.f32 %v944_v12, %v1200_v26  ;;  %2950 = vmatmul.msk.bf16.gmra.mxu0 %vm1403_vm2, %v3943_v27 }
 0x16e   :  { %2967 = vmatmul.msk.bf16.gmra.mxu1 %vm1403_vm2, %v3774_v31  ;;  %2994 = vmatmul.msk.bf16.gmra.mxu2 %vm1403_vm2, %v3742_v55 }
 0x16f   :  { %v1299_v36 = vadd.f32 %v3666_v32, %v1259_v59 }
 0x171   :  { %3023 = vmatmul.msk.bf16.gmra.mxu3 %vm1403_vm2, %v3813_v4  ;;  %v1335_v48 = vmax.f32 %v1299_v36, 0.0  ;;  %v888_v23 = vpop.f32.mrf.mxu2 }
 0x172   :  { %v3967_v9 = vpop.f32.mrf.mxu0  ;;  %v945_v0 = vmax.f32 %v630_v46, %v888_v23 }
 0x173   :  { %v3969_v43 = vpack.c.bf16 %v1335_v48, %v1334_v24  ;;  %v585_v2 = vpop.f32.mrf.mxu1 }
 0x174   :  { %v1203_v57 = vpop.f32.mrf.mxu3 }
 0x175   :  { %v1260_v55 = vmax.f32 %v945_v0, %v1203_v57 }
 0x177   :  { %v1300_v20 = vadd.f32 %v3666_v32, %v1260_v55 }
 0x179   :  { %v1336_v34 = vmax.f32 %v1300_v20, 0.0  ;;  %v890_v39 = vpop.f32.mrf.mxu2 }
 0x17a   :  { %v1456_v58 = vpop.f32.mrf.mxu0  ;;  %v946_v7 = vmax.f32 %v631_v45, %v890_v39 }
 0x17b   :  { %v3977_v61 = vpack.c.bf16 %v1336_v34, %v1335_v48  ;;  %v588_v25 = vpop.f32.mrf.mxu1 }
 0x17c   :  { %v1205_v38 = vpop.f32.mrf.mxu3 }
 0x17d   :  { %v1261_v11 = vmax.f32 %v946_v7, %v1205_v38  ;;  %2951 = vmatmul.msk.bf16.gmra.mxu0 %vm1403_vm2, %v3977_v61 }
 0x17e   :  { %2968 = vmatmul.msk.bf16.gmra.mxu1 %vm1403_vm2, %v3813_v4  ;;  %2995 = vmatmul.msk.bf16.gmra.mxu2 %vm1403_vm2, %v3774_v31  ;;  %v633_v31 = vmax.f32 %v3571_v53, %v3938_v8  ;;  %v634_v53 = vmax.f32 %v3592_v62, %v3954_v41 }
 0x17f   :  { %v1301_v24 = vadd.f32 %v3666_v32, %v1261_v11  ;;  %v635_v11 = vmax.f32 %v3608_v5, %v585_v2  ;;  %v636_v5 = vmax.f32 %v3629_v13, %v588_v25 }
 0x181   :  { %3024 = vmatmul.msk.bf16.gmra.mxu3 %vm1403_vm2, %v3839_v21  ;;  %v1337_v37 = vmax.f32 %v1301_v24, 0.0  ;;  %v893_v30 = vpop.f32.mrf.mxu2 }
 0x182   :  { %v1457_v12 = vpop.f32.mrf.mxu0  ;;  %v947_v29 = vmax.f32 %v632_v51, %v893_v30 }
 0x183   :  { %v3990_v26 = vpack.c.bf16 %v1337_v37, %v1336_v34  ;;  %v590_v15 = vpop.f32.mrf.mxu1 }
 0x184   :  { %v1208_v22 = vpop.f32.mrf.mxu3  ;;  %v637_v25 = vmax.f32 %v3636_v17, %v590_v15 }
 0x185   :  { %v1262_v59 = vmax.f32 %v947_v29, %v1208_v22 }
 0x187   :  { %v1302_v36 = vadd.f32 %v3666_v32, %v1262_v59 }
 0x189   :  { %v1338_v46 = vmax.f32 %v1302_v36, 0.0  ;;  %v895_v48 = vpop.f32.mrf.mxu2 }
 0x18a   :  { %v3995_v23 = vpop.f32.mrf.mxu0  ;;  %v948_v49 = vmax.f32 %v633_v31, %v895_v48  ;;  %v3319_v48 = vld [vmem:[%s4403_s3 + $0x98] sm:$0xff] }
 0x18b   :  { %v3997_v0 = vpack.c.bf16 %v1338_v46, %v1337_v37  ;;  %v3999_v57 = vpop.f32.mrf.mxu1  ;;  %2067 = vmatpush.bf16.msrb.mxu2 %v3319_v48 }
 0x18c   :  { %v1210_v44 = vpop.f32.mrf.mxu3  ;;  %v638_v15 = vmax.f32 %v3566_v50, %v3999_v57 }
 0x18d   :  { %v1263_v47 = vmax.f32 %v948_v49, %v1210_v44  ;;  %3051 = vmatmul.msk.bf16.vlgmr.msra.gmra.mxu0 %vm1403_vm2, %v3787_v40  ;;  %v3322_v49 = vld [vmem:[%s4403_s3 + $0xb0] sm:$0xff] }
 0x18e   :  { %2969 = vmatmul.msk.bf16.gmra.mxu1 %vm1403_vm2, %v3839_v21  ;;  %2996 = vmatmul.msk.bf16.gmra.mxu2 %vm1403_vm2, %v3813_v4 }
 0x18f   :  { %v1303_v55 = vadd.f32 %v3666_v32, %v1263_v47  ;;  %2178 = vmatpush.bf16.msrb.mxu3 %v3322_v49 }
 0x191   :  { %3025 = vmatmul.msk.bf16.gmra.mxu3 %vm1403_vm2, %v3867_v1  ;;  %v1339_v8 = vmax.f32 %v1303_v55, 0.0  ;;  %v898_v20 = vpop.f32.mrf.mxu2 }
 0x192   :  { %v4012_v45 = vpop.f32.mrf.mxu0  ;;  %v949_v40 = vmax.f32 %v634_v53, %v898_v20 }
 0x193   :  { %v4014_v34 = vpack.c.bf16 %v1339_v8, %v1338_v46  ;;  %v4016_v58 = vpop.f32.mrf.mxu1 }
 0x194   :  { %v1213_v39 = vpop.f32.mrf.mxu3 }
 0x195   :  { %v1264_v7 = vmax.f32 %v949_v40, %v1213_v39 }
 0x197   :  { %v1304_v38 = vadd.f32 %v3666_v32, %v1264_v7  ;;  %v3316_v7 = vld [vmem:[%s4403_s3 + $0x80] sm:$0xff] }
 0x198   :  { %1960 = vmatpush.bf16.msrb.mxu1 %v3316_v7 }
 0x199   :  { %v1340_v24 = vmax.f32 %v1304_v38, 0.0  ;;  %v900_v51 = vpop.f32.mrf.mxu2  ;;  %v3325_v38 = vld [vmem:[%s4403_s3 + $0xc8] sm:$0xff] }
 0x19a   :  { %v4020_v37 = vpop.f32.mrf.mxu0  ;;  %v950_v41 = vmax.f32 %v635_v11, %v900_v51  ;;  %2281 = vmatpush.bf16.msrb.mxu0 %v3325_v38 }
 0x19b   :  { %v4022_v62 = vpack.c.bf16 %v1340_v24, %v1339_v8  ;;  %v4024_v12 = vpop.f32.mrf.mxu1 }
 0x19c   :  { %v1215_v30 = vpop.f32.mrf.mxu3 }
 0x19d   :  { %v1265_v29 = vmax.f32 %v950_v41, %v1215_v30  ;;  %3052 = vmatmul.msk.bf16.gmra.mxu0 %vm1403_vm2, %v3818_v19 }
 0x19e   :  { %2970 = vmatmul.msk.bf16.gmra.mxu1 %vm1403_vm2, %v3867_v1  ;;  %2997 = vmatmul.msk.bf16.gmra.mxu2 %vm1403_vm2, %v3839_v21 }
 0x19f   :  { %v1305_v22 = vadd.f32 %v3666_v32, %v1265_v29 }
 0x1a1   :  { %3026 = vmatmul.msk.bf16.gmra.mxu3 %vm1403_vm2, %v3891_v3  ;;  %v1341_v2 = vmax.f32 %v1305_v22, 0.0  ;;  %v903_v59 = vpop.f32.mrf.mxu2 }
 0x1a2   :  { %v4036_v36 = vpop.f32.mrf.mxu0  ;;  %v951_v19 = vmax.f32 %v636_v5, %v903_v59 }
 0x1a3   :  { %v4038_v31 = vpack.c.bf16 %v1341_v2, %v1340_v24  ;;  %v4046_v44 = vpop.f32.mrf.mxu1 }
 0x1a4   :  { %v1218_v46 = vpop.f32.mrf.mxu3 }
 0x1a5   :  { %v1266_v47 = vmax.f32 %v951_v19, %v1218_v46  ;;  %v639_v19 = vmax.f32 %v3573_v54, %v4016_v58  ;;  %v640_v54 = vmax.f32 %v3594_v63, %v4024_v12 }
 0x1a7   :  { %v1306_v13 = vadd.f32 %v3666_v32, %v1266_v47 }
 0x1a9   :  { %v1342_v55 = vmax.f32 %v1306_v13, 0.0  ;;  %v905_v53 = vpop.f32.mrf.mxu2 }
 0x1aa   :  { %v1469_v8 = vpop.f32.mrf.mxu0  ;;  %v952_v40 = vmax.f32 %v637_v25, %v905_v53 }
 0x1ab   :  { %v4050_v20 = vpack.c.bf16 %v1342_v55, %v1341_v2  ;;  %v4058_v11 = vpop.f32.mrf.mxu1 }
 0x1ac   :  { %v1220_v39 = vpop.f32.mrf.mxu3 }
 0x1ad   :  { %v1267_v24 = vmax.f32 %v952_v40, %v1220_v39  ;;  %3053 = vmatmul.msk.bf16.gmra.mxu0 %vm1403_vm2, %v3846_v56 }
 0x1ae   :  { %2971 = vmatmul.msk.bf16.gmra.mxu1 %vm1403_vm2, %v3891_v3  ;;  %2998 = vmatmul.msk.bf16.gmra.mxu2 %vm1403_vm2, %v3867_v1 }
 0x1af   :  { %v1307_v17 = vadd.f32 %v3666_v32, %v1267_v24 }
 0x1b1   :  { %3027 = vmatmul.msk.bf16.gmra.mxu3 %vm1403_vm2, %v3913_v28  ;;  %v1343_v51 = vmax.f32 %v1307_v17, 0.0  ;;  %v908_v41 = vpop.f32.mrf.mxu2 }
 0x1b2   :  { %v1470_v30 = vpop.f32.mrf.mxu0  ;;  %v953_v29 = vmax.f32 %v638_v15, %v908_v41  ;;  %v641_v15 = vmax.f32 %v3610_v6, %v4046_v44  ;;  %v642_v44 = vmax.f32 %v3631_v14, %v4058_v11 }
 0x1b3   :  { %v4071_v56 = vpack.c.bf16 %v1343_v51, %v1342_v55  ;;  %v605_v5 = vpop.f32.mrf.mxu1 }
 0x1b4   :  { %v1223_v22 = vpop.f32.mrf.mxu3 }
 0x1b5   :  { %v1268_v2 = vmax.f32 %v953_v29, %v1223_v22  ;;  %v3315_v22 = vld [vmem:[%s4403_s3 + $0x78] sm:$0xff] }
 0x1b6   :  { %1961 = vmatpush.bf16.msrb.mxu1 %v3315_v22 }
 0x1b7   :  { %v1308_v59 = vadd.f32 %v3666_v32, %v1268_v2 }
 0x1b9   :  { %v1344_v46 = vmax.f32 %v1308_v59, 0.0  ;;  %v910_v48 = vpop.f32.mrf.mxu2 }
 0x1ba   :  { %v4076_v49 = vpop.f32.mrf.mxu0  ;;  %v954_v50 = vmax.f32 %v639_v19, %v910_v48 }
 0x1bb   :  { %v4078_v47 = vpack.c.bf16 %v1344_v46, %v1343_v51  ;;  %v1555_v13 = vpop.f32.mrf.mxu1 }
 0x1bc   :  { %v1225_v57 = vpop.f32.mrf.mxu3 }
 0x1bd   :  { %v1269_v25 = vmax.f32 %v954_v50, %v1225_v57  ;;  %3054 = vmatmul.msk.bf16.gmra.mxu0 %vm1403_vm2, %v3870_v33 }
 0x1be   :  { %2972 = vmatmul.msk.bf16.gmra.mxu1 %vm1403_vm2, %v3913_v28  ;;  %2999 = vmatmul.msk.bf16.gmra.mxu2 %vm1403_vm2, %v3891_v3 }
 0x1bf   :  { %v1309_v55 = vadd.f32 %v3666_v32, %v1269_v25 }
 0x1c1   :  { %3028 = vmatmul.msk.bf16.gmra.mxu3 %vm1403_vm2, %v3936_v35  ;;  %v1345_v58 = vmax.f32 %v1309_v55, 0.0  ;;  %v913_v53 = vpop.f32.mrf.mxu2 }
 0x1c2   :  { %v4091_v8 = vpop.f32.mrf.mxu0  ;;  %v955_v39 = vmax.f32 %v640_v54, %v913_v53 }
 0x1c3   :  { %v4093_v40 = vpack.c.bf16 %v1345_v58, %v1344_v46  ;;  %v1557_v38 = vpop.f32.mrf.mxu1 }
 0x1c4   :  { %v1228_v7 = vpop.f32.mrf.mxu3 }
 0x1c5   :  { %v1270_v24 = vmax.f32 %v955_v39, %v1228_v7  ;;  %v643_v39 = vmax.f32 %v3638_v18, %v605_v5  ;;  %v1556_v18 = vadd.f32 %v1555_v13, %v3918_v42 }
 0x1c7   :  { %v1310_v17 = vadd.f32 %v3666_v32, %v1270_v24 }
 0x1c9   :  { %v1346_v51 = vmax.f32 %v1310_v17, 0.0  ;;  %v915_v41 = vpop.f32.mrf.mxu2 }
 0x1ca   :  { %v4098_v30 = vpop.f32.mrf.mxu0  ;;  %v956_v12 = vmax.f32 %v641_v15, %v915_v41 }
 0x1cb   :  { %v4100_v63 = vpack.c.bf16 %v1346_v51, %v1345_v58  ;;  %v1560_v2 = vpop.f32.mrf.mxu1  ;;  %v3318_v58 = vld [vmem:[%s4403_s3 + $0x90] sm:$0xff] }
 0x1cc   :  { %v1230_v29 = vpop.f32.mrf.mxu3  ;;  %2068 = vmatpush.bf16.msrb.mxu2 %v3318_v58 }
 0x1cd   :  { %v1271_v59 = vmax.f32 %v956_v12, %v1230_v29  ;;  %3055 = vmatmul.msk.bf16.gmra.mxu0 %vm1403_vm2, %v3895_v52  ;;  %v3321_v12 = vld [vmem:[%s4403_s3 + $0xa8] sm:$0xff] }
 0x1ce   :  { %2973 = vmatmul.msk.bf16.gmra.mxu1 %vm1403_vm2, %v3936_v35  ;;  %3000 = vmatmul.msk.bf16.gmra.mxu2 %vm1403_vm2, %v3913_v28 }
 0x1cf   :  { %v1311_v6 = vadd.f32 %v3666_v32, %v1271_v59  ;;  %2179 = vmatpush.bf16.msrb.mxu3 %v3321_v12 }
 0x1d1   :  { %3029 = vmatmul.msk.bf16.gmra.mxu3 %vm1403_vm2, %v3969_v43  ;;  %v1347_v19 = vmax.f32 %v1311_v6, 0.0  ;;  %v918_v46 = vpop.f32.mrf.mxu2 }
 0x1d2   :  { %v4116_v48 = vpop.f32.mrf.mxu0  ;;  %v957_v57 = vmax.f32 %v642_v44, %v918_v46 }
 0x1d3   :  { %v4118_v50 = vpack.c.bf16 %v1347_v19, %v1346_v51  ;;  %v1562_v55 = vpop.f32.mrf.mxu1 }
 0x1d4   :  { %v1233_v25 = vpop.f32.mrf.mxu3 }
 0x1d5   :  { %v1272_v54 = vmax.f32 %v957_v57, %v1233_v25  ;;  %v1558_v25 = vadd.f32 %v1557_v38, %v3934_v60  ;;  %v1561_v60 = vadd.f32 %v1560_v2, %v3941_v10 }
 0x1d7   :  { %v1312_v53 = vadd.f32 %v3666_v32, %v1272_v54 }
 0x1d9   :  { %v1348_v14 = vmax.f32 %v1312_v53, 0.0  ;;  %v920_v11 = vpop.f32.mrf.mxu2 }
 0x1da   :  { %v1482_v7 = vpop.f32.mrf.mxu0  ;;  %v958_v17 = vmax.f32 %v643_v39, %v920_v11 }
 0x1db   :  { %v4125_v24 = vpack.c.bf16 %v1348_v14, %v1347_v19  ;;  %v1565_v51 = vpop.f32.mrf.mxu1 }
 0x1dc   :  { %v1235_v15 = vpop.f32.mrf.mxu3  ;;  %v1563_v51 = vadd.f32 %v1562_v55, %v3967_v9 }
 0x1dd   :  { %v1273_v41 = vmax.f32 %v958_v17, %v1235_v15  ;;  %3056 = vmatmul.msk.bf16.gmra.mxu0 %vm1403_vm2, %v3920_v16 }
 0x1de   :  { %2974 = vmatmul.msk.bf16.gmra.mxu1 %vm1403_vm2, %v3969_v43  ;;  %3001 = vmatmul.msk.bf16.gmra.mxu2 %vm1403_vm2, %v3936_v35 }
 0x1df   :  { %v1313_v29 = vadd.f32 %v3666_v32, %v1273_v41  ;;  %v3324_v32 = vld [vmem:[%s4403_s3 + $0xc0] sm:$0xff] }
 0x1e0   :  { %2282 = vmatpush.bf16.msrb.mxu0 %v3324_v32 }
 0x1e1   :  { %3030 = vmatmul.msk.bf16.gmra.mxu3 %vm1403_vm2, %v3990_v26  ;;  %v1349_v5 = vmax.f32 %v1313_v29, 0.0  ;;  %v1642_v59 = vpop.f32.mrf.mxu2 }
 0x1e2   :  { %v1483_v22 = vpop.f32.mrf.mxu0  ;;  %v1691_v44 = vadd.f32 %v1642_v59, %v1556_v18 }
 0x1e3   :  { %v4140_v6 = vpack.c.bf16 %v1349_v5, %v1348_v14  ;;  %v1566_v46 = vpop.f32.mrf.mxu1 }
 0x1e4   :  { %v1749_v19 = vpop.f32.mrf.mxu3 }
 0x1e5   :  { %v1798_v57 = vadd.f32 %v1749_v19, %v1691_v44 }
 0x1e9   :  { %v1644_v42 = vpop.f32.mrf.mxu2 }
 0x1ea   :  { %v4146_v54 = vpop.f32.mrf.mxu0  ;;  %v1692_v13 = vadd.f32 %v1644_v42, %v1558_v25 }
 0x1eb   :  { %v1568_v53 = vpop.f32.mrf.mxu1 }
 0x1ec   :  { %v1751_v58 = vpop.f32.mrf.mxu3 }
 0x1ed   :  { %v1799_v39 = vadd.f32 %v1751_v58, %v1692_v13  ;;  %3057 = vmatmul.msk.bf16.gmra.mxu0 %vm1403_vm2, %v3943_v27 }
 0x1ee   :  { %3002 = vmatmul.msk.bf16.gmra.mxu2 %vm1403_vm2, %v3969_v43  ;;  %3080 = vmatmul.msk.bf16.vlgmr.msrb.gmra.mxu1 %vm1403_vm2, %v3813_v4 }
 0x1f1   :  { %3031 = vmatmul.msk.bf16.gmra.mxu3 %vm1403_vm2, %v4014_v34  ;;  %v1647_v14 = vpop.f32.mrf.mxu2 }
 0x1f2   :  { %v4157_v38 = vpop.f32.mrf.mxu0  ;;  %v1693_v11 = vadd.f32 %v1647_v14, %v1561_v60 }
 0x1f3   :  { %v1570_v17 = vpop.f32.mrf.mxu1 }
 0x1f4   :  { %v1754_v7 = vpop.f32.mrf.mxu3  ;;  %v1571_v14 = vadd.f32 %v1570_v17, %v4012_v45 }
 0x1f5   :  { %v1800_v15 = vadd.f32 %v1754_v7, %v1693_v11 }
 0x1f9   :  { %v1649_v12 = vpop.f32.mrf.mxu2 }
 0x1fa   :  { %v4160_v41 = vpop.f32.mrf.mxu0  ;;  %v1694_v29 = vadd.f32 %v1649_v12, %v1563_v51 }
 0x1fb   :  { %v1573_v4 = vpop.f32.mrf.mxu1 }
 0x1fc   :  { %v1756_v18 = vpop.f32.mrf.mxu3 }
 0x1fd   :  { %v1801_v5 = vadd.f32 %v1756_v18, %v1694_v29  ;;  %3058 = vmatmul.msk.bf16.gmra.mxu0 %vm1403_vm2, %v3977_v61 }
 0x1fe   :  { %3003 = vmatmul.msk.bf16.gmra.mxu2 %vm1403_vm2, %v3990_v26  ;;  %3081 = vmatmul.msk.bf16.gmra.mxu1 %vm1403_vm2, %v3839_v21  ;;  %v1569_v21 = vadd.f32 %v1568_v53, %v3995_v23  ;;  %v1574_v23 = vadd.f32 %v1573_v4, %v4020_v37 }
 0x201   :  { %3032 = vmatmul.msk.bf16.gmra.mxu3 %vm1403_vm2, %v4038_v31  ;;  %v1652_v9 = vpop.f32.mrf.mxu2 }
 0x202   :  { %v4170_v10 = vpop.f32.mrf.mxu0 }
 0x203   :  { %v1575_v55 = vpop.f32.mrf.mxu1 }
 0x204   :  { %v1759_v2 = vpop.f32.mrf.mxu3 }
 0x205   :  { %v1576_v2 = vadd.f32 %v1575_v55, %v4036_v36 }
 0x209   :  { %v1653_v22 = vpop.f32.mrf.mxu2 }
 0x20a   :  { %v1860_v59 = vpop.f32.mrf.mxu0 }
 0x20b   :  { %v4172_v19 = vadd.f32 %v1860_v59, %v1798_v57  ;;  %v1578_v32 = vpop.f32.mrf.mxu1 }
 0x20c   :  { %v1760_v44 = vpop.f32.mrf.mxu3 }
 0x20d   :  { %3059 = vmatmul.msk.bf16.gmra.mxu0 %vm1403_vm2, %v3997_v0 }
 0x20e   :  { %3082 = vmatmul.msk.bf16.gmra.mxu1 %vm1403_vm2, %v3867_v1  ;;  %3109 = vmatmul.msk.bf16.vlgmr.msrb.gmra.mxu2 %vm1403_vm2, %v3867_v1 }
 0x211   :  { %3138 = vmatmul.msk.bf16.vlgmr.msrb.gmra.mxu3 %vm1403_vm2, %v3870_v33  ;;  %v1655_v46 = vpop.f32.mrf.mxu2 }
 0x212   :  { %v1862_v25 = vpop.f32.mrf.mxu0  ;;  %v1695_v42 = vadd.f32 %v1655_v46, %v1569_v21 }
 0x213   :  { %v4183_v13 = vadd.f32 %v1862_v25, %v1799_v39  ;;  %v1579_v58 = vpop.f32.mrf.mxu1 }
 0x214   :  { %v1762_v57 = vpop.f32.mrf.mxu3 }
 0x215   :  { %v1802_v60 = vadd.f32 %v1762_v57, %v1695_v42 }
 0x219   :  { %v1657_v11 = vpop.f32.mrf.mxu2 }
 0x21a   :  { %v1865_v7 = vpop.f32.mrf.mxu0  ;;  %v1696_v51 = vadd.f32 %v1657_v11, %v1571_v14 }
 0x21b   :  { %v4186_v1 = vadd.f32 %v1865_v7, %v1800_v15  ;;  %v1581_v29 = vpop.f32.mrf.mxu1 }
 0x21c   :  { %v1764_v12 = vpop.f32.mrf.mxu3 }
 0x21d   :  { %v1803_v33 = vadd.f32 %v1764_v12, %v1696_v51  ;;  %3060 = vmatmul.msk.bf16.gmra.mxu0 %vm1403_vm2, %v4022_v62 }
 0x21e   :  { %3083 = vmatmul.msk.bf16.gmra.mxu1 %vm1403_vm2, %v3891_v3  ;;  %3110 = vmatmul.msk.bf16.gmra.mxu2 %vm1403_vm2, %v3891_v3 }
 0x221   :  { %3139 = vmatmul.msk.bf16.gmra.mxu3 %vm1403_vm2, %v3895_v52  ;;  %v1660_v45 = vpop.f32.mrf.mxu2 }
 0x222   :  { %v1867_v53 = vpop.f32.mrf.mxu0  ;;  %v1697_v39 = vadd.f32 %v1660_v45, %v1574_v23 }
 0x223   :  { %v4197_v15 = vadd.f32 %v1867_v53, %v1801_v5  ;;  %v1583_v18 = vpop.f32.mrf.mxu1 }
 0x224   :  { %v1767_v17 = vpop.f32.mrf.mxu3 }
 0x225   :  { %v1804_v9 = vadd.f32 %v1767_v17, %v1697_v39 }
 0x229   :  { %v1662_v22 = vpop.f32.mrf.mxu2 }
 0x22a   :  { %v1870_v59 = vpop.f32.mrf.mxu0  ;;  %v1698_v44 = vadd.f32 %v1662_v22, %v1576_v2 }
 0x22b   :  { %v1586_v21 = vpop.f32.mrf.mxu1 }
 0x22c   :  { %v1769_v32 = vpop.f32.mrf.mxu3 }
 0x22d   :  { %v1805_v46 = vadd.f32 %v1769_v32, %v1698_v44  ;;  %3061 = vmatmul.msk.bf16.gmra.mxu0 %vm1403_vm2, %v4050_v20 }
 0x22e   :  { %3084 = vmatmul.msk.bf16.gmra.mxu1 %vm1403_vm2, %v3913_v28  ;;  %3111 = vmatmul.msk.bf16.gmra.mxu2 %vm1403_vm2, %v3913_v28 }
 0x231   :  { %3140 = vmatmul.msk.bf16.gmra.mxu3 %vm1403_vm2, %v3920_v16  ;;  %v1665_v52 = vpop.f32.mrf.mxu2  ;;  %v1582_v16 = vadd.f32 %v1581_v29, %v4076_v49  ;;  %v1587_v49 = vadd.f32 %v1586_v21, %v4098_v30 }
 0x232   :  { %v1871_v37 = vpop.f32.mrf.mxu0 }
 0x233   :  { %v1588_v4 = vpop.f32.mrf.mxu1 }
 0x234   :  { %v1772_v36 = vpop.f32.mrf.mxu3 }
 0x239   :  { %v1666_v5 = vpop.f32.mrf.mxu2 }
 0x23a   :  { %v1873_v55 = vpop.f32.mrf.mxu0 }
 0x23b   :  { %v4208_v42 = vadd.f32 %v1873_v55, %v1802_v60  ;;  %v1591_v57 = vpop.f32.mrf.mxu1 }
 0x23c   :  { %v1773_v25 = vpop.f32.mrf.mxu3 }
 0x23d   :  { %3167 = vmatmul.msk.bf16.vlgmr.msrb.gmra.mxu0 %vm1403_vm2, %v3891_v3  ;;  %v1584_v3 = vadd.f32 %v1583_v18, %v4091_v8 }
 0x23e   :  { %3085 = vmatmul.msk.bf16.gmra.mxu1 %vm1403_vm2, %v3936_v35  ;;  %3112 = vmatmul.msk.bf16.gmra.mxu2 %vm1403_vm2, %v3936_v35 }
 0x241   :  { %3141 = vmatmul.msk.bf16.gmra.mxu3 %vm1403_vm2, %v3943_v27  ;;  %v1668_v58 = vpop.f32.mrf.mxu2 }
 0x242   :  { %v1875_v14 = vpop.f32.mrf.mxu0  ;;  %v1699_v11 = vadd.f32 %v1668_v58, %v1582_v16 }
 0x243   :  { %v4219_v7 = vadd.f32 %v1875_v14, %v1803_v33  ;;  %v1592_v51 = vpop.f32.mrf.mxu1 }
 0x244   :  { %v1775_v60 = vpop.f32.mrf.mxu3 }
 0x245   :  { %v1806_v12 = vadd.f32 %v1775_v60, %v1699_v11 }
 0x249   :  { %v1670_v23 = vpop.f32.mrf.mxu2 }
 0x24a   :  { %v1878_v45 = vpop.f32.mrf.mxu0  ;;  %v1700_v53 = vadd.f32 %v1670_v23, %v1584_v3 }
 0x24b   :  { %v4222_v17 = vadd.f32 %v1878_v45, %v1804_v9  ;;  %v1594_v2 = vpop.f32.mrf.mxu1 }
 0x24c   :  { %v1777_v39 = vpop.f32.mrf.mxu3 }
 0x24d   :  { %v1807_v27 = vadd.f32 %v1777_v39, %v1700_v53  ;;  %3168 = vmatmul.msk.bf16.gmra.mxu0 %vm1403_vm2, %v3913_v28  ;;  %v1589_v28 = vadd.f32 %v1588_v4, %v4116_v48 }
 0x24e   :  { %3086 = vmatmul.msk.bf16.gmra.mxu1 %vm1403_vm2, %v3969_v43  ;;  %3113 = vmatmul.msk.bf16.gmra.mxu2 %vm1403_vm2, %v3969_v43 }
 0x251   :  { %3142 = vmatmul.msk.bf16.gmra.mxu3 %vm1403_vm2, %v3977_v61  ;;  %v1673_v8 = vpop.f32.mrf.mxu2 }
 0x252   :  { %v1880_v29 = vpop.f32.mrf.mxu0  ;;  %v1701_v33 = vadd.f32 %v1673_v8, %v1587_v49 }
 0x253   :  { %v4233_v9 = vadd.f32 %v1880_v29, %v1805_v46  ;;  %v1596_v22 = vpop.f32.mrf.mxu1 }
 0x254   :  { %v1780_v18 = vpop.f32.mrf.mxu3 }
 0x255   :  { %v1808_v59 = vadd.f32 %v1780_v18, %v1701_v33 }
 0x259   :  { %v1675_v44 = vpop.f32.mrf.mxu2 }
 0x25a   :  { %v1883_v32 = vpop.f32.mrf.mxu0  ;;  %v1702_v52 = vadd.f32 %v1675_v44, %v1589_v28 }
 0x25b   :  { %v1599_v36 = vpop.f32.mrf.mxu1 }
 0x25c   :  { %v1782_v37 = vpop.f32.mrf.mxu3 }
 0x25d   :  { %v1809_v5 = vadd.f32 %v1782_v37, %v1702_v52  ;;  %3169 = vmatmul.msk.bf16.gmra.mxu0 %vm1403_vm2, %v3936_v35 }
 0x25e   :  { %3087 = vmatmul.msk.bf16.gmra.mxu1 %vm1403_vm2, %v3990_v26  ;;  %3114 = vmatmul.msk.bf16.gmra.mxu2 %vm1403_vm2, %v3990_v26 }
 0x261   :  { %3143 = vmatmul.msk.bf16.gmra.mxu3 %vm1403_vm2, %v3997_v0  ;;  %v1678_v61 = vpop.f32.mrf.mxu2  ;;  %v1595_v0 = vadd.f32 %v1594_v2, %v4146_v54  ;;  %v3330_v2 = vld [vmem:[%s4406_s5 + $0x18] sm:$0xff] }
 0x262   :  { %v1884_v30 = vpop.f32.mrf.mxu0  ;;  %2396 = vmatpush.bf16.msra.mxu1 %v3330_v2 }
 0x263   :  { %v4244_v21 = vpop.f32.mrf.mxu1 }
 0x264   :  { %v1785_v48 = vpop.f32.mrf.mxu3 }
 0x269   :  { %v1679_v46 = vpop.f32.mrf.mxu2 }
 0x26a   :  { %v1886_v4 = vpop.f32.mrf.mxu0 }
 0x26b   :  { %v4246_v25 = vadd.f32 %v1886_v4, %v1806_v12  ;;  %v1963_v35 = vpop.f32.mrf.mxu1 }
 0x26c   :  { %v1786_v55 = vpop.f32.mrf.mxu3  ;;  %v2012_v57 = vadd.f32 %v1963_v35, %v4172_v19 }
 0x26d   :  { %3170 = vmatmul.msk.bf16.gmra.mxu0 %vm1403_vm2, %v3969_v43  ;;  %v1597_v43 = vadd.f32 %v1596_v22, %v4157_v38  ;;  %v1600_v38 = vadd.f32 %v1599_v36, %v4160_v41  ;;  %v3332_v36 = vld [vmem:[%s4406_s5 + $0x28] sm:$0xff] }
 0x26e   :  { %3088 = vmatmul.msk.bf16.gmra.mxu1 %vm1403_vm2, %v4014_v34  ;;  %3115 = vmatmul.msk.bf16.gmra.mxu2 %vm1403_vm2, %v4014_v34 }
 0x26f   :  { %2463 = vmatpush.bf16.msra.mxu3 %v3332_v36 }
 0x271   :  { %3144 = vmatmul.msk.bf16.gmra.mxu3 %vm1403_vm2, %v4022_v62  ;;  %v1681_v16 = vpop.f32.mrf.mxu2 }
 0x272   :  { %v1888_v58 = vpop.f32.mrf.mxu0  ;;  %v1703_v14 = vadd.f32 %v1681_v16, %v1595_v0 }
 0x273   :  { %v4258_v60 = vadd.f32 %v1888_v58, %v1807_v27  ;;  %v1965_v19 = vpop.f32.mrf.mxu1 }
 0x274   :  { %v1788_v11 = vpop.f32.mrf.mxu3 }
 0x275   :  { %v1810_v51 = vadd.f32 %v1788_v11, %v1703_v14 }
 0x279   :  { %v1683_v12 = vpop.f32.mrf.mxu2 }
 0x27a   :  { %v1891_v3 = vpop.f32.mrf.mxu0  ;;  %v1704_v23 = vadd.f32 %v1683_v12, %v1597_v43 }
 0x27b   :  { %v4261_v53 = vadd.f32 %v1891_v3, %v1808_v59  ;;  %v1968_v39 = vpop.f32.mrf.mxu1 }
 0x27c   :  { %v1790_v45 = vpop.f32.mrf.mxu3  ;;  %v2014_v54 = vadd.f32 %v1968_v39, %v4186_v1 }
 0x27d   :  { %v1811_v62 = vadd.f32 %v1790_v45, %v1704_v23  ;;  %3171 = vmatmul.msk.bf16.gmra.mxu0 %vm1403_vm2, %v3990_v26 }
 0x27e   :  { %3089 = vmatmul.msk.bf16.gmra.mxu1 %vm1403_vm2, %v4038_v31  ;;  %3116 = vmatmul.msk.bf16.gmra.mxu2 %vm1403_vm2, %v4038_v31 }
 0x281   :  { %3145 = vmatmul.msk.bf16.gmra.mxu3 %vm1403_vm2, %v4050_v20  ;;  %v1686_v1 = vpop.f32.mrf.mxu2 }
 0x282   :  { %v1893_v27 = vpop.f32.mrf.mxu0  ;;  %v1705_v49 = vadd.f32 %v1686_v1, %v1600_v38 }
 0x283   :  { %v4276_v8 = vadd.f32 %v1893_v27, %v1809_v5  ;;  %v1970_v29 = vpop.f32.mrf.mxu1 }
 0x284   :  { %v1793_v26 = vpop.f32.mrf.mxu3 }
 0x285   :  { %v1812_v33 = vadd.f32 %v1793_v26, %v1705_v49 }
 0x289   :  { %v1688_v18 = vpop.f32.mrf.mxu2 }
 0x28a   :  { %v1896_v22 = vpop.f32.mrf.mxu0 }
 0x28b   :  { %v1973_v28 = vpop.f32.mrf.mxu1 }
 0x28c   :  { %v1795_v59 = vpop.f32.mrf.mxu3 }
 0x28d   :  { %3172 = vmatmul.msk.bf16.gmra.mxu0 %vm1403_vm2, %v4014_v34  ;;  %v2013_v34 = vadd.f32 %v1965_v19, %v4183_v13 }
 0x28e   :  { %3090 = vmatmul.msk.bf16.gmra.mxu1 %vm1403_vm2, %v4071_v56  ;;  %3117 = vmatmul.msk.bf16.gmra.mxu2 %vm1403_vm2, %v4071_v56 }
 0x291   :  { %3146 = vmatmul.msk.bf16.gmra.mxu3 %vm1403_vm2, %v4078_v47  ;;  %v2070_v41 = vpop.f32.mrf.mxu2 }
 0x292   :  { %v1897_v20 = vpop.f32.mrf.mxu0  ;;  %v2119_v44 = vadd.f32 %v2070_v41, %v2012_v57 }
 0x293   :  { %v1974_v52 = vpop.f32.mrf.mxu1 }
 0x294   :  { %v2181_v32 = vpop.f32.mrf.mxu3 }
 0x295   :  { %v2230_v37 = vadd.f32 %v2181_v32, %v2119_v44 }
 0x299   :  { %v2072_v61 = vpop.f32.mrf.mxu2 }
 0x29a   :  { %v1899_v5 = vpop.f32.mrf.mxu0  ;;  %v2120_v48 = vadd.f32 %v2072_v61, %v2013_v34 }
 0x29b   :  { %v4290_v30 = vadd.f32 %v1899_v5, %v1810_v51  ;;  %v1976_v47 = vpop.f32.mrf.mxu1  ;;  %v1602_v51 = vadd.f32 %v4244_v21, %v4170_v10 }
 0x29c   :  { %v2183_v46 = vpop.f32.mrf.mxu3  ;;  %v2016_v55 = vadd.f32 %v1976_v47, %v4208_v42  ;;  %v2015_v42 = vadd.f32 %v1970_v29, %v4197_v15 }
 0x29d   :  { %v2231_v4 = vadd.f32 %v2183_v46, %v2120_v48  ;;  %3173 = vmatmul.msk.bf16.gmra.mxu0 %vm1403_vm2, %v4038_v31  ;;  %v1706_v23 = vadd.f32 %v1688_v18, %v1602_v51 }
 0x29e   :  { %3118 = vmatmul.msk.bf16.gmra.mxu2 %vm1403_vm2, %v4093_v40 }
 0x29f   :  { %v1813_v10 = vadd.f32 %v1795_v59, %v1706_v23 }
 0x2a1   :  { %3147 = vmatmul.msk.bf16.gmra.mxu3 %vm1403_vm2, %v4100_v63  ;;  %v2075_v35 = vpop.f32.mrf.mxu2 }
 0x2a2   :  { %v1901_v13 = vpop.f32.mrf.mxu0  ;;  %v2121_v0 = vadd.f32 %v2075_v35, %v2014_v54 }
 0x2a3   :  { %v4299_v57 = vadd.f32 %v1901_v13, %v1811_v62  ;;  %v1978_v58 = vpop.f32.mrf.mxu1  ;;  %v3329_v13 = vld [vmem:[%s4406_s5 + $0x10] sm:$0xff] }
 0x2a4   :  { %v2186_v16 = vpop.f32.mrf.mxu3  ;;  %v2017_v11 = vadd.f32 %v1978_v58, %v4219_v7  ;;  %2397 = vmatpush.bf16.msra.mxu1 %v3329_v13 }
 0x2a5   :  { %v2232_v14 = vadd.f32 %v2186_v16, %v2121_v0 }
 0x2a9   :  { %v2077_v31 = vpop.f32.mrf.mxu2 }
 0x2aa   :  { %v1904_v19 = vpop.f32.mrf.mxu0  ;;  %v2122_v63 = vadd.f32 %v2077_v31, %v2015_v42 }
 0x2ab   :  { %v4305_v43 = vadd.f32 %v1904_v19, %v1812_v33  ;;  %v1981_v3 = vpop.f32.mrf.mxu1 }
 0x2ac   :  { %v2188_v12 = vpop.f32.mrf.mxu3  ;;  %v4308_v39 = vadd.f32 %v1981_v3, %v4222_v17 }
 0x2ad   :  { %v2233_v45 = vadd.f32 %v2188_v12, %v2122_v63  ;;  %3174 = vmatmul.msk.bf16.gmra.mxu0 %vm1403_vm2, %v4071_v56 }
 0x2ae   :  { %3119 = vmatmul.msk.bf16.gmra.mxu2 %vm1403_vm2, %v4118_v50 }
 0x2b1   :  { %3148 = vmatmul.msk.bf16.gmra.mxu3 %vm1403_vm2, %v4125_v24  ;;  %v2080_v7 = vpop.f32.mrf.mxu2 }
 0x2b2   :  { %v1906_v15 = vpop.f32.mrf.mxu0  ;;  %v3328_v7 = vld [vmem:[%s4406_s5 + $0x8] sm:$0xff] }
 0x2b3   :  { %v4316_v21 = vadd.f32 %v1906_v15, %v1813_v10  ;;  %v1983_v54 = vpop.f32.mrf.mxu1  ;;  %2424 = vmatpush.bf16.msrb.mxu1 %v3328_v7 }
 0x2b4   :  { %v2191_v62 = vpop.f32.mrf.mxu3  ;;  %v4319_v2 = vadd.f32 %v1983_v54, %v4233_v9  ;;  %v3327_v54 = vld [vmem:[%s4406_s5] sm:$0xff] }
 0x2b7   :  { %2425 = vmatpush.bf16.msrb.mxu1 %v3327_v54 }
 0x2b9   :  { %v2081_v17 = vpop.f32.mrf.mxu2 }
 0x2ba   :  { %v2284_v38 = vpop.f32.mrf.mxu0 }
 0x2bb   :  { %v2333_v56 = vadd.f32 %v2284_v38, %v2230_v37  ;;  %v1986_v27 = vpop.f32.mrf.mxu1 }
 0x2bc   :  { %v2192_v1 = vpop.f32.mrf.mxu3 }
 0x2bd   :  { %3175 = vmatmul.msk.bf16.gmra.mxu0 %vm1403_vm2, %v4093_v40 }
 0x2c1   :  { %v2083_v49 = vpop.f32.mrf.mxu2 }
 0x2c2   :  { %v2286_v24 = vpop.f32.mrf.mxu0  ;;  %v2123_v26 = vadd.f32 %v2083_v49, %v2016_v55 }
 0x2c3   :  { %v2334_v33 = vadd.f32 %v2286_v24, %v2231_v4  ;;  %v1987_v18 = vpop.f32.mrf.mxu1 }
 0x2c4   :  { %v2194_v29 = vpop.f32.mrf.mxu3 }
 0x2c5   :  { %v2234_v22 = vadd.f32 %v2194_v29, %v2123_v26  ;;  %v2350_v59 = vmax.f32 %v2333_v56, %v2334_v33 }
 0x2c9   :  { %v2085_v28 = vpop.f32.mrf.mxu2 }
 0x2ca   :  { %v2289_v20 = vpop.f32.mrf.mxu0  ;;  %v2124_v9 = vadd.f32 %v2085_v28, %v2017_v11  ;;  %v4348_v28 = vld [vmem:[%s4405_s4] ss:$0 sm:$0xff] }
 0x2cb   :  { %v1989_v44 = vpop.f32.mrf.mxu1  ;;  %v2335_v36 = vadd.f32 %v2289_v20, %v2232_v14 }
 0x2cc   :  { %v2196_v41 = vpop.f32.mrf.mxu3  ;;  %v2020_v52 = vadd.f32 %v1989_v44, %v4246_v25 }
 0x2cd   :  { %v2235_v32 = vadd.f32 %v2196_v41, %v2124_v9  ;;  %3176 = vmatmul.msk.bf16.gmra.mxu0 %vm1403_vm2, %v4118_v50 }
 0x2d1   :  { %v2088_v40 = vpop.f32.mrf.mxu2 }
 0x2d2   :  { %v2291_v37 = vpop.f32.mrf.mxu0  ;;  %v2125_v10 = vadd.f32 %v2088_v40, %v4308_v39 }
 0x2d3   :  { %v2336_v5 = vadd.f32 %v2291_v37, %v2233_v45  ;;  %v1991_v61 = vpop.f32.mrf.mxu1 }
 0x2d4   :  { %v2199_v34 = vpop.f32.mrf.mxu3  ;;  %v2021_v46 = vadd.f32 %v1991_v61, %v4258_v60 }
 0x2d5   :  { %v2363_v48 = vmax.f32 %v2335_v36, %v2336_v5  ;;  %v2236_v62 = vadd.f32 %v2199_v34, %v2125_v10 }
 0x2d9   :  { %v2090_v47 = vpop.f32.mrf.mxu2 }
 0x2da   :  { %v2294_v4 = vpop.f32.mrf.mxu0  ;;  %v2126_v39 = vadd.f32 %v2090_v47, %v4319_v2 }
 0x2db   :  { %v1994_v25 = vpop.f32.mrf.mxu1 }
 0x2dc   :  { %v2201_v55 = vpop.f32.mrf.mxu3  ;;  %v2022_v35 = vadd.f32 %v1994_v25, %v4261_v53  ;;  %v3331_v53 = vld [vmem:[%s4406_s5 + $0x20] sm:$0xff]  ;;  %v2524_v25 = vld [vmem:[%s4407_s7 + $0x38] sm:$0xff] }
 0x2dd   :  { %3177 = vmatmul.msk.bf16.gmra.mxu0 %vm1403_vm2, %v4140_v6  ;;  %2464 = vmatpush.bf16.msra.mxu3 %v3331_v53  ;;  %v2237_v26 = vadd.f32 %v2201_v55, %v2126_v39 }
 0x2de   :  { %2541 = vmatpush.msra.mxu2 %v2524_v25 }
 0x2e1   :  { %v2093_v50 = vpop.f32.mrf.mxu2 }
 0x2e2   :  { %v2295_v0 = vpop.f32.mrf.mxu0 }
 0x2e3   :  { %v1996_v58 = vpop.f32.mrf.mxu1 }
 0x2e4   :  { %v2204_v16 = vpop.f32.mrf.mxu3  ;;  %v2023_v60 = vadd.f32 %v1996_v58, %v4276_v8 }
 0x2e9   :  { %v2094_v14 = vpop.f32.mrf.mxu2 }
 0x2ea   :  { %v2297_v11 = vpop.f32.mrf.mxu0 }
 0x2eb   :  { %v2337_v19 = vadd.f32 %v2297_v11, %v2234_v22  ;;  %v1999_v31 = vpop.f32.mrf.mxu1 }
 0x2ec   :  { %v2205_v42 = vpop.f32.mrf.mxu3 }
 0x2ed   :  { %v2351_v51 = vmax.f32 %v2350_v59, %v2337_v19 }
 0x2f1   :  { %v2096_v63 = vpop.f32.mrf.mxu2 }
 0x2f2   :  { %v2299_v6 = vpop.f32.mrf.mxu0  ;;  %v2127_v12 = vadd.f32 %v2096_v63, %v2020_v52  ;;  %v3334_v63 = vld [vmem:[%s4406_s5 + $0x38] sm:$0xff] }
 0x2f3   :  { %v2338_v23 = vadd.f32 %v2299_v6, %v2235_v32  ;;  %v2000_v45 = vpop.f32.mrf.mxu1 }
 0x2f4   :  { %v2207_v3 = vpop.f32.mrf.mxu3 }
 0x2f5   :  { %v2238_v8 = vadd.f32 %v2207_v3, %v2127_v12  ;;  %v2352_v15 = vmax.f32 %v2351_v51, %v2338_v23  ;;  %v2523_v51 = vld [vmem:[%s4407_s7 + $0x30] sm:$0xff] }
 0x2f6   :  { %2542 = vmatpush.msra.mxu2 %v2523_v51 }
 0x2f7   :  { %v2356_v61 = vadd.f32 %v4348_v28, %v2352_v15  ;;  %v3333_v15 = vld [vmem:[%s4406_s5 + $0x30] sm:$0xff] }
 0x2f9   :  { %v2098_v17 = vpop.f32.mrf.mxu2 }
 0x2fa   :  { %v2302_v38 = vpop.f32.mrf.mxu0  ;;  %v2128_v1 = vadd.f32 %v2098_v17, %v2021_v46  ;;  %v2357_v46 = vmax.f32 %v2356_v61, 0.0 }
 0x2fb   :  { %v2339_v27 = vadd.f32 %v2302_v38, %v2236_v62  ;;  %v2002_v19 = vpop.f32.mrf.mxu1 }
 0x2fc   :  { %v2209_v56 = vpop.f32.mrf.mxu3  ;;  %v2358_v55 = vpack.c.bf16 %v2357_v46, %v2357_v46  ;;  %v2024_v3 = vadd.f32 %v2002_v19, %v4290_v30  ;;  %v2522_v30 = vld [vmem:[%s4407_s7 + $0x28] sm:$0xff] }
 0x2fd   :  { %v2239_v49 = vadd.f32 %v2209_v56, %v2128_v1  ;;  %v2364_v24 = vmax.f32 %v2363_v48, %v2339_v27  ;;  %v2521_v56 = vld [vmem:[%s4407_s7 + $0x20] sm:$0xff]  ;;  %2543 = vmatpush.msra.mxu2 %v2522_v30 }
 0x2ff   :  { %2544 = vmatpush.msra.mxu2 %v2521_v56 }
 0x301   :  { %v2101_v29 = vpop.f32.mrf.mxu2 }
 0x302   :  { %v2304_v33 = vpop.f32.mrf.mxu0  ;;  %v2129_v18 = vadd.f32 %v2101_v29, %v2022_v35 }
 0x303   :  { %v2340_v59 = vadd.f32 %v2304_v33, %v2237_v26  ;;  %v2004_v23 = vpop.f32.mrf.mxu1 }
 0x304   :  { %v2212_v22 = vpop.f32.mrf.mxu3  ;;  %v2025_v62 = vadd.f32 %v2004_v23, %v4299_v57 }
 0x305   :  { %v2240_v20 = vadd.f32 %v2212_v22, %v2129_v18  ;;  %v2365_v9 = vmax.f32 %v2364_v24, %v2340_v59 }
 0x307   :  { %v2366_v41 = vadd.f32 %v4348_v28, %v2365_v9 }
 0x309   :  { %v2367_v44 = vmax.f32 %v2366_v41, 0.0  ;;  %v2103_v32 = vpop.f32.mrf.mxu2 }
 0x30a   :  { %v2307_v2 = vpop.f32.mrf.mxu0  ;;  %v2130_v40 = vadd.f32 %v2103_v32, %v2023_v60 }
 0x30b   :  { %v2368_v52 = vpack.c.bf16 %v2367_v44, %v2367_v44  ;;  %v2007_v27 = vpop.f32.mrf.mxu1 }
 0x30c   :  { %v2214_v37 = vpop.f32.mrf.mxu3  ;;  %v2026_v57 = vadd.f32 %v2007_v27, %v4305_v43 }
 0x30d   :  { %v2241_v36 = vadd.f32 %v2214_v37, %v2130_v40  ;;  %3190 = vmatmul.msk.bf16.vlgmr.msra.gmra.mxu1 %vm2386_vm3, %v2368_v52 }
 0x30e   :  { %2503 = vmatpush.bf16.msra.mxu1 %v3334_v63 }
 0x311   :  { %v2106_v34 = vpop.f32.mrf.mxu2 }
 0x312   :  { %v2308_v5 = vpop.f32.mrf.mxu0  ;;  %2504 = vmatpush.bf16.msra.mxu1 %v3333_v15 }
 0x313   :  { %v2009_v59 = vpop.f32.mrf.mxu1 }
 0x314   :  { %v2217_v48 = vpop.f32.mrf.mxu3  ;;  %v2027_v32 = vadd.f32 %v2009_v59, %v4316_v21  ;;  %v2520_v21 = vld [vmem:[%s4407_s7 + $0x18] sm:$0xff] }
 0x315   :  { %2545 = vmatpush.msra.mxu2 %v2520_v21 }
 0x319   :  { %v2107_v47 = vpop.f32.mrf.mxu2 }
 0x31a   :  { %v2310_v4 = vpop.f32.mrf.mxu0 }
 0x31b   :  { %v2341_v50 = vadd.f32 %v2310_v4, %v2238_v8  ;;  %v2519_v4 = vld [vmem:[%s4407_s7 + $0x10] sm:$0xff] }
 0x31c   :  { %v2218_v13 = vpop.f32.mrf.mxu3  ;;  %2546 = vmatpush.msra.mxu2 %v2519_v4 }
 0x31d   :  { %3199 = vmatmul.msk.bf16.vlgmr.msrb.gmra.mxu1 %vm2386_vm3, %v2358_v55  ;;  %v2518_v55 = vld [vmem:[%s4407_s7 + $0x8] sm:$0xff] }
 0x31e   :  { %2547 = vmatpush.msra.mxu2 %v2518_v55 }
 0x321   :  { %v2109_v53 = vpop.f32.mrf.mxu2 }
 0x322   :  { %v2312_v35 = vpop.f32.mrf.mxu0  ;;  %v2131_v45 = vadd.f32 %v2109_v53, %v2024_v3  ;;  %v3344_v53 = vld [vmem:[%s4409_s8] ss:$0 sm:$0xff] }
 0x323   :  { %v2342_v0 = vadd.f32 %v2312_v35, %v2239_v49 }
 0x324   :  { %v2220_v6 = vpop.f32.mrf.mxu3 }
 0x325   :  { %v2431_v16 = vmax.f32 %v2341_v50, %v2342_v0  ;;  %v2242_v8 = vadd.f32 %v2220_v6, %v2131_v45 }
 0x329   :  { %v2111_v10 = vpop.f32.mrf.mxu2 }
 0x32a   :  { %v2315_v58 = vpop.f32.mrf.mxu0  ;;  %v2132_v38 = vadd.f32 %v2111_v10, %v2025_v62 }
 0x32b   :  { %v2343_v14 = vadd.f32 %v2315_v58, %v2240_v20 }
 0x32c   :  { %v2222_v17 = vpop.f32.mrf.mxu3 }
 0x32d   :  { %v2243_v49 = vadd.f32 %v2222_v17, %v2132_v38 }
 0x331   :  { %v2114_v39 = vpop.f32.mrf.mxu2 }
 0x332   :  { %v2317_v60 = vpop.f32.mrf.mxu0  ;;  %v2133_v29 = vadd.f32 %v2114_v39, %v2026_v57 }
 0x333   :  { %v2344_v11 = vadd.f32 %v2317_v60, %v2241_v36 }
 0x334   :  { %v2225_v18 = vpop.f32.mrf.mxu3 }
 0x335   :  { %v2471_v42 = vmax.f32 %v2343_v14, %v2344_v11  ;;  %v2244_v20 = vadd.f32 %v2225_v18, %v2133_v29  ;;  %v3343_v14 = vld [vmem:[%s4408_s6] ss:$0 sm:$0xff] }
 0x339   :  { %v2116_v41 = vpop.f32.mrf.mxu2 }
 0x33a   :  { %v2320_v31 = vpop.f32.mrf.mxu0  ;;  %v2134_v40 = vadd.f32 %v2116_v41, %v2027_v32 }
 0x33c   :  { %v2227_v43 = vpop.f32.mrf.mxu3 }
 0x33d   :  { %v2245_v36 = vadd.f32 %v2227_v43, %v2134_v40 }
 0x342   :  { %v2321_v12 = vpop.f32.mrf.mxu0 }
 0x34a   :  { %v2323_v7 = vpop.f32.mrf.mxu0 }
 0x34b   :  { %v2345_v54 = vadd.f32 %v2323_v7, %v2242_v8 }
 0x34d   :  { %v2432_v1 = vmax.f32 %v2431_v16, %v2345_v54 }
 0x352   :  { %v2325_v24 = vpop.f32.mrf.mxu0 }
 0x353   :  { %v2346_v26 = vadd.f32 %v2325_v24, %v2243_v49 }
 0x355   :  { %v2433_v33 = vmax.f32 %v2432_v1, %v2346_v26 }
 0x357   :  { %v2434_v22 = vadd.f32 %v4348_v28, %v2433_v33 }
 0x359   :  { %v2435_v9 = vmax.f32 %v2434_v22, 0.0 }
 0x35a   :  { %v2328_v44 = vpop.f32.mrf.mxu0 }
 0x35b   :  { %v2436_v2 = vpack.c.bf16 %v2435_v9, %v2435_v9  ;;  %v2347_v52 = vadd.f32 %v2328_v44, %v2244_v20 }
 0x35d   :  { %v2472_v37 = vmax.f32 %v2471_v42, %v2347_v52  ;;  %3212 = vmatmul.msk.bf16.vlgmr.msra.gmra.mxu3 %vm2386_vm3, %v2436_v2 }
 0x362   :  { %v2330_v34 = vpop.f32.mrf.mxu0 }
 0x363   :  { %v2348_v5 = vadd.f32 %v2330_v34, %v2245_v36 }
 0x365   :  { %v2473_v61 = vmax.f32 %v2472_v37, %v2348_v5 }
 0x367   :  { %v2474_v48 = vadd.f32 %v4348_v28, %v2473_v61  ;;  %v2517_v28 = vld [vmem:[%s4407_s7] sm:$0xff] }
 0x368   :  { %2548 = vmatpush.msra.mxu2 %v2517_v28 }
 0x369   :  { %v2475_v46 = vmax.f32 %v2474_v48, 0.0 }
 0x36b   :  { %v2476_v47 = vpack.c.bf16 %v2475_v46, %v2475_v46 }
 0x36d   :  { %3225 = vmatmul.msk.bf16.vlgmr.msra.gmra.mxu1 %vm2386_vm3, %v2476_v47 }
 0x38a   :  { %v2399_v13 = vpop.f32.mrf.mxu1 }
 0x392   :  { %v2401_v25 = vpop.f32.mrf.mxu1 }
 0x39a   :  { %v2427_v35 = vpop.f32.mrf.mxu1 }
 0x39b   :  { %v2428_v50 = vadd.f32 %v2427_v35, %v2399_v13 }
 0x3a2   :  { %v2429_v0 = vpop.f32.mrf.mxu1 }
 0x3e0   :  { %v2466_v16 = vpop.f32.mrf.mxu3 }
 0x3e1   :  { %v2470_v60 = vadd.f32 %v2466_v16, %v2428_v50 }
 0x3e8   :  { %v2468_v58 = vpop.f32.mrf.mxu3 }
 0x3ea   :  { %v2506_v11 = vpop.f32.mrf.mxu1 }
 0x3eb   :  { %v2510_v42 = vadd.f32 %v2506_v11, %v2470_v60 }
 0x3ed   :  { %v2515_v19 = vadd.f32 %v3343_v14, %v2510_v42 }
 0x3ef   :  { %v2516_v31 = vmax.f32 %v2515_v19, 0.0 }
 0x3f1   :  { %3226 = vmatmul.msk.f32.vlgmr.msra.gmra.mxu2 %vm2529_vm4, %v2516_v31 }
 0x3f2   :  { %v2508_v51 = vpop.f32.mrf.mxu1 }
 0x474   :  { %v2550_v63 = vpop.f32.mrf.mxu2 }
 0x475   :  { %v2551_v6 = vadd.f32 %v3344_v53, %v2550_v63 }
 0x477   :  { %2554 = vst.msk [vmem:[%s4410_s9] sm:$0xff] %vm2553_vm5, %v2551_v6 }

</bundles_post_ra>
